<compile_context>
chip_gen: v5e
topology: v5e:2x2
jax: 0.10.0
libtpu: 0.0.40
codegen_flags: <defaults>
</compile_context>

<pallas_src>
import jax
import jax.numpy as jnp
import numpy as np
from jax.experimental import pallas as pl
from jax.experimental.pallas import tpu as pltpu

# ----------------- DistillationModel hyper-parameters (baked as constants) -----------------
ALPHA = 0.5          # prior probability that the default pairing is correct
T_T = 100.0          # teacher target temperature (T_t default)
VV_COEF = 1.0
TT_COEF = 1.0
REMOVE_DIAG = 0.0    # float(remove_diag=False)
T_C = 0.07           # student contrastive temperature (student.contrastive_loss.T)
T_S = 10.0           # distillation temperature (dist_loss.T_s)

EMB_DIM = 128


# =========================== fused forward kernel ===========================
def _fused_kernel(x_ref, txt_ref, w_img_ref, w_txt_ref, o_ref):
    D = EMB_DIM
    B = x_ref.shape[0]

    # ---- encoders: one N=2D(=256) bf16 projection per modality, f32 accumulation ----
    # (256-wide N exactly fills the v6e/v7x MXU; maps to 2x128 column passes on v5e.)
    img_proj = jnp.dot(x_ref[...], w_img_ref[...],
                       preferred_element_type=jnp.float32)    # [B, 2D] f32
    txt_proj = jnp.dot(txt_ref[...], w_txt_ref[...],
                       preferred_element_type=jnp.float32)    # [B, 2D] f32

    # ---- one fused L2 normalization over all four embedding blocks ----
    # Lane slices at offsets 0 / 128 are vreg-aligned; axis-0 concat is whole-vreg copies.
    e_raw = jnp.concatenate(
        [img_proj[:, :D], txt_proj[:, :D], img_proj[:, D:], txt_proj[:, D:]],
        axis=0)                                                # [4B, D]
    e = e_raw * jax.lax.rsqrt(jnp.sum(e_raw * e_raw, axis=-1, keepdims=True) + 1e-12)
    img_s = e[0 * B:1 * B]
    txt_s = e[1 * B:2 * B]
    img_t = e[2 * B:3 * B]
    txt_t = e[3 * B:4 * B]

    # ---- student logits: img_s @ txt_s.T ; txt_logits_s == transpose (never built) ----
    img_logits = jax.lax.dot_general(img_s, txt_s, (((1,), (1,)), ((), ())),
                                     preferred_element_type=jnp.float32)   # [B, B]

    # ---- teacher target logits: A = vv*vv_coef + tt*tt_coef + vt, ONE K=3D matmul ----
    lhs = jnp.concatenate(
        [img_t if VV_COEF == 1.0 else img_t * VV_COEF,
         txt_t if TT_COEF == 1.0 else txt_t * TT_COEF,
         img_t], axis=1)                                       # [B, 3D]
    rhs = jnp.concatenate([img_t, txt_t, txt_t], axis=1)       # [B, 3D]
    a_base = jax.lax.dot_general(lhs, rhs, (((1,), (1,)), ((), ())),
                                 preferred_element_type=jnp.float32)       # [B, B]

    row = jax.lax.broadcasted_iota(jnp.int32, (B, B), 0)
    col = jax.lax.broadcasted_iota(jnp.int32, (B, B), 1)
    eye = (row == col).astype(jnp.float32)

    if REMOVE_DIAG != 0.0:
        a_base = a_base - eye * (REMOVE_DIAG * 100.0 * (VV_COEF + TT_COEF))
    A = a_base * T_T
    # txt-side target logits are A.T (vv/tt symmetric, tv = vt.T): one matrix suffices.

    # ---- student contrastive loss: symmetric CE with diagonal targets ----
    # txt_logits_s = img_logits.T, so the second CE is the column-wise LSE of the SAME
    # matrix: one exp pass with a GLOBAL max (safe: |logits| <= 1, 1/T_c ~ 14.3).
    s1 = img_logits * (1.0 / T_C)
    m1 = jnp.max(s1)
    e1 = jnp.exp(s1 - m1)
    lse_row1 = m1 + jnp.log(jnp.sum(e1, axis=1, keepdims=True))   # [B,1]
    lse_col1 = m1 + jnp.log(jnp.sum(e1, axis=0, keepdims=True))   # [1,B]
    sum_diag = jnp.sum(s1 * eye)
    contrastive = 0.5 * ((jnp.sum(lse_row1) - sum_diag) + (jnp.sum(lse_col1) - sum_diag)) / B

    # ---- teacher target softmaxes (ot_dist=False); approx reciprocal on EUP ----
    e_row = jnp.exp(A - jnp.max(A, axis=1, keepdims=True))
    img_tgt = e_row * pl.reciprocal(jnp.sum(e_row, axis=1, keepdims=True), approx=True)
    e_col = jnp.exp(A - jnp.max(A, axis=0, keepdims=True))
    txt_tgt_T = e_col * pl.reciprocal(jnp.sum(e_col, axis=0, keepdims=True), approx=True)

    # ---- KL distillation loss (batchmean), one shared exp pass for both pred softmaxes ----
    # log_softmax rows of (txt_logits*T_s) == column-wise LSE of (img_logits*T_s);
    # target rows sum to 1 so the LSE term factors out of each KL sum.
    s2 = img_logits * T_S
    m2 = jnp.max(s2)
    e2 = jnp.exp(s2 - m2)
    lse_row2 = m2 + jnp.log(jnp.sum(e2, axis=1, keepdims=True))   # [B,1]
    lse_col2 = m2 + jnp.log(jnp.sum(e2, axis=0, keepdims=True))   # [1,B]
    kl_img = (jnp.sum(img_tgt * (jnp.log(img_tgt + 1e-12) - s2)) + jnp.sum(lse_row2)) / B
    kl_txt = (jnp.sum(txt_tgt_T * (jnp.log(txt_tgt_T + 1e-12) - s2)) + jnp.sum(lse_col2)) / B
    dist = kl_img + kl_txt

    o_ref[0] = ALPHA * contrastive
    o_ref[1] = (1.0 - ALPHA) * dist


def fused_forward(x, texts, w_img, w_txt):
    B, din = x.shape
    dt = texts.shape[1]
    n2 = 2 * EMB_DIM
    bytes_in = (x.size + texts.size + w_img.size + w_txt.size) * 2   # bf16 inputs
    flops = 2 * B * n2 * (din + dt) + 2 * B * B * (EMB_DIM + 3 * EMB_DIM)
    vmem = pl.BlockSpec(memory_space=pltpu.MemorySpace.VMEM)
    return pl.pallas_call(
        _fused_kernel,
        out_shape=jax.ShapeDtypeStruct((2,), jnp.float32),
        in_specs=[vmem, vmem, vmem, vmem],
        out_specs=pl.BlockSpec(memory_space=pltpu.MemorySpace.SMEM),
        cost_estimate=pl.CostEstimate(flops=flops,
                                      transcendentals=6 * B * B + 4 * B,
                                      bytes_accessed=bytes_in + 8),
    )(x, texts, w_img, w_txt)


# =========================== full forward ===========================
@jax.jit
def distillation_forward(images, texts, kparams):
    B = images.shape[0]
    # layout: NCHW flattened -> [B, C*H*W] (features on lanes); bf16 MXU operands.
    x = images.reshape(B, -1).astype(jnp.bfloat16)
    txt = texts.astype(jnp.bfloat16)
    out = fused_forward(x, txt, kparams["w_img"], kparams["w_txt"])
    return {"contrastive": out[0], "distillation": out[1]}


# =========================== pure-JAX reference ===========================
def reference_forward(images, texts, p):
    # Same precision policy as the kernel: bf16 matmul operands, f32 accumulation/elementwise.
    x = images.reshape(images.shape[0], -1).astype(jnp.bfloat16)
    txt = texts.astype(jnp.bfloat16)

    def proj(a, w):
        return jnp.dot(a, w.astype(jnp.bfloat16), preferred_element_type=jnp.float32)

    def l2(y):
        return y * jax.lax.rsqrt(jnp.sum(y * y, axis=-1, keepdims=True) + 1e-12)

    img_s = l2(proj(x, p["ws_img"])); txt_s = l2(proj(txt, p["ws_txt"]))
    img_t = l2(proj(x, p["wt_img"])); txt_t = l2(proj(txt, p["wt_txt"]))

    img_logits = img_s @ txt_s.T
    txt_logits = txt_s @ img_s.T
    B = x.shape[0]
    eye = jnp.eye(B, dtype=jnp.float32)

    def ce(logits):
        s = logits / T_C
        return jnp.mean(jax.nn.logsumexp(s, axis=1) - jnp.sum(s * eye, axis=1))

    contrastive = 0.5 * (ce(img_logits) + ce(txt_logits))

    vt = img_t @ txt_t.T; tv = txt_t @ img_t.T
    vv = img_t @ img_t.T; tt = txt_t @ txt_t.T
    dp = eye * (REMOVE_DIAG * 100.0)
    vv = (vv - dp) * VV_COEF
    tt = (tt - dp) * TT_COEF
    img_cost = -(vv + tt + vt)
    txt_cost = -(vv + tt + tv)
    img_tgt = jax.nn.softmax(-img_cost * T_T, axis=1)
    txt_tgt = jax.nn.softmax(-txt_cost * T_T, axis=1)

    def kl(pred, tgt):
        logp = jax.nn.log_softmax(pred * T_S, axis=1)
        return jnp.sum(tgt * (jnp.log(tgt + 1e-12) - logp)) / B

    dist = kl(img_logits, img_tgt) + kl(txt_logits, txt_tgt)
    return {"contrastive": ALPHA * contrastive, "distillation": (1.0 - ALPHA) * dist}


# =========================== main ===========================
if __name__ == "__main__":
    key = jax.random.PRNGKey(0)
    k_img, k_txt, k1, k2, k3, k4 = jax.random.split(key, 6)

    B, C, H, W = 8, 4, 16, 16          # B multiple of 8 (sublane-aligned slices)
    TXT_DIM = 128
    images = jax.random.normal(k_img, (B, C, H, W), jnp.float32)
    texts = jax.random.normal(k_txt, (B, TXT_DIM), jnp.float32)

    # f32 per-encoder weights (reference view of the parameters).
    params = {
        "ws_img": 0.02 * jax.random.normal(k1, (C * H * W, EMB_DIM), jnp.float32),
        "ws_txt": 0.02 * jax.random.normal(k2, (TXT_DIM, EMB_DIM), jnp.float32),
        "wt_img": 0.02 * jax.random.normal(k3, (C * H * W, EMB_DIM), jnp.float32),
        "wt_txt": 0.02 * jax.random.normal(k4, (TXT_DIM, EMB_DIM), jnp.float32),
    }
    # Kernel parameters: student|teacher weights pre-concatenated along N and stored as
    # bf16 once at parameter-build time (hoisted out of the kernel per perf review).
    kparams = {
        "w_img": jnp.concatenate([params["ws_img"], params["wt_img"]], axis=1).astype(jnp.bfloat16),
        "w_txt": jnp.concatenate([params["ws_txt"], params["wt_txt"]], axis=1).astype(jnp.bfloat16),
    }

    losses = distillation_forward(images, texts, kparams)
    jax.block_until_ready(losses)

    ref = reference_forward(images, texts, params)
    np.testing.assert_allclose(np.asarray(losses["contrastive"]),
                               np.asarray(ref["contrastive"]), rtol=1e-3, atol=1e-3)
    np.testing.assert_allclose(np.asarray(losses["distillation"]),
                               np.asarray(ref["distillation"]), rtol=1e-3, atol=1e-3)

    print("KERNEL_OK")
</pallas_src>

<mosaic_0001>
module attributes {stable_mosaic.version = 11 : i64} {
  func.func @_fused_kernel(%arg0: memref<8x1024xbf16, #tpu.memory_space<vmem>>, %arg1: memref<8x128xbf16, #tpu.memory_space<vmem>>, %arg2: memref<1024x256xbf16, #tpu.memory_space<vmem>>, %arg3: memref<128x256xbf16, #tpu.memory_space<vmem>>, %arg4: memref<2xf32, #tpu.memory_space<smem>>) attributes {dimension_semantics = [], scalar_prefetch = 0 : i64, scratch_operands = 0 : i64, tpu.core_type = #tpu.core_type<tc>} {
    %c0 = arith.constant 0 : index
    %c0_0 = arith.constant 0 : index
    %0 = vector.load %arg0[%c0, %c0_0] : memref<8x1024xbf16, #tpu.memory_space<vmem>>, vector<8x1024xbf16>
    %c0_1 = arith.constant 0 : index
    %c0_2 = arith.constant 0 : index
    %1 = vector.load %arg2[%c0_1, %c0_2] : memref<1024x256xbf16, #tpu.memory_space<vmem>>, vector<1024x256xbf16>
    %cst = arith.constant dense<0.000000e+00> : vector<8x256xf32>
    %2 = tpu.matmul %0, %1, %cst {dimension_numbers = #tpu.dot_dimension_numbers<[1], [0], [0], [1], [0, 0, 1, 1], [], []>} : vector<8x1024xbf16>, vector<1024x256xbf16>, vector<8x256xf32> -> vector<8x256xf32>
    %c0_3 = arith.constant 0 : index
    %c0_4 = arith.constant 0 : index
    %3 = vector.load %arg1[%c0_3, %c0_4] : memref<8x128xbf16, #tpu.memory_space<vmem>>, vector<8x128xbf16>
    %c0_5 = arith.constant 0 : index
    %c0_6 = arith.constant 0 : index
    %4 = vector.load %arg3[%c0_5, %c0_6] : memref<128x256xbf16, #tpu.memory_space<vmem>>, vector<128x256xbf16>
    %cst_7 = arith.constant dense<0.000000e+00> : vector<8x256xf32>
    %5 = tpu.matmul %3, %4, %cst_7 {dimension_numbers = #tpu.dot_dimension_numbers<[1], [0], [0], [1], [0, 0, 1, 1], [], []>} : vector<8x128xbf16>, vector<128x256xbf16>, vector<8x256xf32> -> vector<8x256xf32>
    %6 = vector.extract_strided_slice %2 {offsets = [0, 0], sizes = [8, 128], strides = [1, 1]} : vector<8x256xf32> to vector<8x128xf32>
    %7 = vector.extract_strided_slice %5 {offsets = [0, 0], sizes = [8, 128], strides = [1, 1]} : vector<8x256xf32> to vector<8x128xf32>
    %8 = vector.extract_strided_slice %2 {offsets = [0, 128], sizes = [8, 128], strides = [1, 1]} : vector<8x256xf32> to vector<8x128xf32>
    %9 = vector.extract_strided_slice %5 {offsets = [0, 128], sizes = [8, 128], strides = [1, 1]} : vector<8x256xf32> to vector<8x128xf32>
    %10 = tpu.concatenate %6, %7, %8, %9 in 0 : vector<8x128xf32>, vector<8x128xf32>, vector<8x128xf32>, vector<8x128xf32> -> vector<32x128xf32>
    %11 = arith.mulf %10, %10 : vector<32x128xf32>
    %cst_8 = arith.constant dense<0.000000e+00> : vector<32xf32>
    %12 = vector.multi_reduction <add>, %11, %cst_8 [1] : vector<32x128xf32> to vector<32xf32>
    %13 = vector.shape_cast %12 : vector<32xf32> to vector<32x1xf32>
    %cst_9 = arith.constant 9.99999996E-13 : f32
    %14 = vector.broadcast %cst_9 : f32 to vector<32x1xf32>
    %15 = arith.addf %13, %14 : vector<32x1xf32>
    %16 = math.rsqrt %15 : vector<32x1xf32>
    %17 = vector.broadcast %16 : vector<32x1xf32> to vector<32x128xf32>
    %18 = arith.mulf %10, %17 : vector<32x128xf32>
    %19 = vector.extract_strided_slice %18 {offsets = [0, 0], sizes = [8, 128], strides = [1, 1]} : vector<32x128xf32> to vector<8x128xf32>
    %20 = vector.extract_strided_slice %18 {offsets = [8, 0], sizes = [8, 128], strides = [1, 1]} : vector<32x128xf32> to vector<8x128xf32>
    %21 = vector.extract_strided_slice %18 {offsets = [16, 0], sizes = [8, 128], strides = [1, 1]} : vector<32x128xf32> to vector<8x128xf32>
    %22 = vector.extract_strided_slice %18 {offsets = [24, 0], sizes = [8, 128], strides = [1, 1]} : vector<32x128xf32> to vector<8x128xf32>
    %cst_10 = arith.constant dense<0.000000e+00> : vector<8x8xf32>
    %23 = tpu.matmul %19, %20, %cst_10 {dimension_numbers = #tpu.dot_dimension_numbers<[1], [1], [0], [0], [0, 0, 1, 0], [], []>} : vector<8x128xf32>, vector<8x128xf32>, vector<8x8xf32> -> vector<8x8xf32>
    %24 = tpu.concatenate %21, %22, %21 in 1 : vector<8x128xf32>, vector<8x128xf32>, vector<8x128xf32> -> vector<8x384xf32>
    %25 = tpu.concatenate %21, %22, %22 in 1 : vector<8x128xf32>, vector<8x128xf32>, vector<8x128xf32> -> vector<8x384xf32>
    %cst_11 = arith.constant dense<0.000000e+00> : vector<8x8xf32>
    %26 = tpu.matmul %24, %25, %cst_11 {dimension_numbers = #tpu.dot_dimension_numbers<[1], [1], [0], [0], [0, 0, 1, 0], [], []>} : vector<8x384xf32>, vector<8x384xf32>, vector<8x8xf32> -> vector<8x8xf32>
    %27 = tpu.iota {dimensions = array<i32: 0>} : vector<8x8xi32>
    %28 = tpu.iota {dimensions = array<i32: 1>} : vector<8x8xi32>
    %29 = arith.cmpi eq, %27, %28 : vector<8x8xi32>
    %30 = arith.extui %29 : vector<8x8xi1> to vector<8x8xi32>
    %31 = arith.sitofp %30 : vector<8x8xi32> to vector<8x8xf32>
    %cst_12 = arith.constant 1.000000e+02 : f32
    %32 = vector.broadcast %cst_12 : f32 to vector<8x8xf32>
    %33 = arith.mulf %26, %32 : vector<8x8xf32>
    %cst_13 = arith.constant 14.2857141 : f32
    %34 = vector.broadcast %cst_13 : f32 to vector<8x8xf32>
    %35 = arith.mulf %23, %34 : vector<8x8xf32>
    %36 = vector.shape_cast %35 : vector<8x8xf32> to vector<1x8x8xf32>
    %cst_14 = arith.constant dense<0xFF800000> : vector<1xf32>
    %37 = vector.multi_reduction <maximumf>, %36, %cst_14 [1, 2] : vector<1x8x8xf32> to vector<1xf32>
    %38 = vector.shape_cast %37 : vector<1xf32> to vector<1x1x1xf32>
    %39 = vector.extract %38[0, 0, 0] : f32 from vector<1x1x1xf32>
    %40 = vector.broadcast %39 : f32 to vector<8x8xf32>
    %41 = arith.subf %35, %40 : vector<8x8xf32>
    %42 = math.exp %41 : vector<8x8xf32>
    %cst_15 = arith.constant dense<0.000000e+00> : vector<8xf32>
    %43 = vector.multi_reduction <add>, %42, %cst_15 [1] : vector<8x8xf32> to vector<8xf32>
    %44 = vector.shape_cast %43 : vector<8xf32> to vector<8x1xf32>
    %45 = math.log %44 : vector<8x1xf32>
    %46 = vector.broadcast %39 : f32 to vector<8x1xf32>
    %47 = arith.addf %46, %45 : vector<8x1xf32>
    %cst_16 = arith.constant dense<0.000000e+00> : vector<8xf32>
    %48 = vector.multi_reduction <add>, %42, %cst_16 [0] : vector<8x8xf32> to vector<8xf32>
    %49 = vector.shape_cast %48 : vector<8xf32> to vector<1x8xf32>
    %50 = math.log %49 : vector<1x8xf32>
    %51 = vector.broadcast %39 : f32 to vector<1x8xf32>
    %52 = arith.addf %51, %50 : vector<1x8xf32>
    %53 = arith.mulf %35, %31 : vector<8x8xf32>
    %54 = vector.shape_cast %53 : vector<8x8xf32> to vector<1x8x8xf32>
    %cst_17 = arith.constant dense<0.000000e+00> : vector<1xf32>
    %55 = vector.multi_reduction <add>, %54, %cst_17 [1, 2] : vector<1x8x8xf32> to vector<1xf32>
    %56 = vector.shape_cast %55 : vector<1xf32> to vector<1x1x1xf32>
    %57 = vector.extract %56[0, 0, 0] : f32 from vector<1x1x1xf32>
    %58 = vector.shape_cast %47 : vector<8x1xf32> to vector<1x8x1xf32>
    %cst_18 = arith.constant dense<0.000000e+00> : vector<1xf32>
    %59 = vector.multi_reduction <add>, %58, %cst_18 [1, 2] : vector<1x8x1xf32> to vector<1xf32>
    %60 = vector.shape_cast %59 : vector<1xf32> to vector<1x1x1xf32>
    %61 = vector.extract %60[0, 0, 0] : f32 from vector<1x1x1xf32>
    %62 = arith.subf %61, %57 : f32
    %63 = vector.shape_cast %52 : vector<1x8xf32> to vector<1x1x8xf32>
    %cst_19 = arith.constant dense<0.000000e+00> : vector<1xf32>
    %64 = vector.multi_reduction <add>, %63, %cst_19 [1, 2] : vector<1x1x8xf32> to vector<1xf32>
    %65 = vector.shape_cast %64 : vector<1xf32> to vector<1x1x1xf32>
    %66 = vector.extract %65[0, 0, 0] : f32 from vector<1x1x1xf32>
    %67 = arith.subf %66, %57 : f32
    %68 = arith.addf %62, %67 : f32
    %cst_20 = arith.constant 5.000000e-01 : f32
    %69 = arith.mulf %cst_20, %68 : f32
    %cst_21 = arith.constant 8.000000e+00 : f32
    %70 = arith.divf %69, %cst_21 : f32
    %cst_22 = arith.constant dense<0xFF800000> : vector<8xf32>
    %71 = vector.multi_reduction <maximumf>, %33, %cst_22 [1] : vector<8x8xf32> to vector<8xf32>
    %72 = vector.shape_cast %71 : vector<8xf32> to vector<8x1xf32>
    %73 = vector.broadcast %72 : vector<8x1xf32> to vector<8x8xf32>
    %74 = arith.subf %33, %73 : vector<8x8xf32>
    %75 = math.exp %74 : vector<8x8xf32>
    %cst_23 = arith.constant dense<0.000000e+00> : vector<8xf32>
    %76 = vector.multi_reduction <add>, %75, %cst_23 [1] : vector<8x8xf32> to vector<8xf32>
    %77 = vector.shape_cast %76 : vector<8xf32> to vector<8x1xf32>
    %78 = tpu.reciprocal %77 {approx = true} : vector<8x1xf32> -> vector<8x1xf32>
    %79 = vector.broadcast %78 : vector<8x1xf32> to vector<8x8xf32>
    %80 = arith.mulf %75, %79 : vector<8x8xf32>
    %cst_24 = arith.constant dense<0xFF800000> : vector<8xf32>
    %81 = vector.multi_reduction <maximumf>, %33, %cst_24 [0] : vector<8x8xf32> to vector<8xf32>
    %82 = vector.shape_cast %81 : vector<8xf32> to vector<1x8xf32>
    %83 = vector.broadcast %82 : vector<1x8xf32> to vector<8x8xf32>
    %84 = arith.subf %33, %83 : vector<8x8xf32>
    %85 = math.exp %84 : vector<8x8xf32>
    %cst_25 = arith.constant dense<0.000000e+00> : vector<8xf32>
    %86 = vector.multi_reduction <add>, %85, %cst_25 [0] : vector<8x8xf32> to vector<8xf32>
    %87 = vector.shape_cast %86 : vector<8xf32> to vector<1x8xf32>
    %88 = tpu.reciprocal %87 {approx = true} : vector<1x8xf32> -> vector<1x8xf32>
    %89 = vector.broadcast %88 : vector<1x8xf32> to vector<8x8xf32>
    %90 = arith.mulf %85, %89 : vector<8x8xf32>
    %cst_26 = arith.constant 1.000000e+01 : f32
    %91 = vector.broadcast %cst_26 : f32 to vector<8x8xf32>
    %92 = arith.mulf %23, %91 : vector<8x8xf32>
    %93 = vector.shape_cast %92 : vector<8x8xf32> to vector<1x8x8xf32>
    %cst_27 = arith.constant dense<0xFF800000> : vector<1xf32>
    %94 = vector.multi_reduction <maximumf>, %93, %cst_27 [1, 2] : vector<1x8x8xf32> to vector<1xf32>
    %95 = vector.shape_cast %94 : vector<1xf32> to vector<1x1x1xf32>
    %96 = vector.extract %95[0, 0, 0] : f32 from vector<1x1x1xf32>
    %97 = vector.broadcast %96 : f32 to vector<8x8xf32>
    %98 = arith.subf %92, %97 : vector<8x8xf32>
    %99 = math.exp %98 : vector<8x8xf32>
    %cst_28 = arith.constant dense<0.000000e+00> : vector<8xf32>
    %100 = vector.multi_reduction <add>, %99, %cst_28 [1] : vector<8x8xf32> to vector<8xf32>
    %101 = vector.shape_cast %100 : vector<8xf32> to vector<8x1xf32>
    %102 = math.log %101 : vector<8x1xf32>
    %103 = vector.broadcast %96 : f32 to vector<8x1xf32>
    %104 = arith.addf %103, %102 : vector<8x1xf32>
    %cst_29 = arith.constant dense<0.000000e+00> : vector<8xf32>
    %105 = vector.multi_reduction <add>, %99, %cst_29 [0] : vector<8x8xf32> to vector<8xf32>
    %106 = vector.shape_cast %105 : vector<8xf32> to vector<1x8xf32>
    %107 = math.log %106 : vector<1x8xf32>
    %108 = vector.broadcast %96 : f32 to vector<1x8xf32>
    %109 = arith.addf %108, %107 : vector<1x8xf32>
    %cst_30 = arith.constant 9.99999996E-13 : f32
    %110 = vector.broadcast %cst_30 : f32 to vector<8x8xf32>
    %111 = arith.addf %80, %110 : vector<8x8xf32>
    %112 = math.log %111 : vector<8x8xf32>
    %113 = arith.subf %112, %92 : vector<8x8xf32>
    %114 = arith.mulf %80, %113 : vector<8x8xf32>
    %115 = vector.shape_cast %114 : vector<8x8xf32> to vector<1x8x8xf32>
    %cst_31 = arith.constant dense<0.000000e+00> : vector<1xf32>
    %116 = vector.multi_reduction <add>, %115, %cst_31 [1, 2] : vector<1x8x8xf32> to vector<1xf32>
    %117 = vector.shape_cast %116 : vector<1xf32> to vector<1x1x1xf32>
    %118 = vector.extract %117[0, 0, 0] : f32 from vector<1x1x1xf32>
    %119 = vector.shape_cast %104 : vector<8x1xf32> to vector<1x8x1xf32>
    %cst_32 = arith.constant dense<0.000000e+00> : vector<1xf32>
    %120 = vector.multi_reduction <add>, %119, %cst_32 [1, 2] : vector<1x8x1xf32> to vector<1xf32>
    %121 = vector.shape_cast %120 : vector<1xf32> to vector<1x1x1xf32>
    %122 = vector.extract %121[0, 0, 0] : f32 from vector<1x1x1xf32>
    %123 = arith.addf %118, %122 : f32
    %cst_33 = arith.constant 8.000000e+00 : f32
    %124 = arith.divf %123, %cst_33 : f32
    %cst_34 = arith.constant 9.99999996E-13 : f32
    %125 = vector.broadcast %cst_34 : f32 to vector<8x8xf32>
    %126 = arith.addf %90, %125 : vector<8x8xf32>
    %127 = math.log %126 : vector<8x8xf32>
    %128 = arith.subf %127, %92 : vector<8x8xf32>
    %129 = arith.mulf %90, %128 : vector<8x8xf32>
    %130 = vector.shape_cast %129 : vector<8x8xf32> to vector<1x8x8xf32>
    %cst_35 = arith.constant dense<0.000000e+00> : vector<1xf32>
    %131 = vector.multi_reduction <add>, %130, %cst_35 [1, 2] : vector<1x8x8xf32> to vector<1xf32>
    %132 = vector.shape_cast %131 : vector<1xf32> to vector<1x1x1xf32>
    %133 = vector.extract %132[0, 0, 0] : f32 from vector<1x1x1xf32>
    %134 = vector.shape_cast %109 : vector<1x8xf32> to vector<1x1x8xf32>
    %cst_36 = arith.constant dense<0.000000e+00> : vector<1xf32>
    %135 = vector.multi_reduction <add>, %134, %cst_36 [1, 2] : vector<1x1x8xf32> to vector<1xf32>
    %136 = vector.shape_cast %135 : vector<1xf32> to vector<1x1x1xf32>
    %137 = vector.extract %136[0, 0, 0] : f32 from vector<1x1x1xf32>
    %138 = arith.addf %133, %137 : f32
    %cst_37 = arith.constant 8.000000e+00 : f32
    %139 = arith.divf %138, %cst_37 : f32
    %140 = arith.addf %124, %139 : f32
    %cst_38 = arith.constant 5.000000e-01 : f32
    %141 = arith.mulf %cst_38, %70 : f32
    %c0_39 = arith.constant 0 : index
    %142 = memref.load %arg4[%c0_39] : memref<2xf32, #tpu.memory_space<smem>>
    memref.store %141, %arg4[%c0_39] : memref<2xf32, #tpu.memory_space<smem>>
    %cst_40 = arith.constant 5.000000e-01 : f32
    %143 = arith.mulf %cst_40, %140 : f32
    %c1 = arith.constant 1 : index
    %144 = memref.load %arg4[%c1] : memref<2xf32, #tpu.memory_space<smem>>
    memref.store %143, %arg4[%c1] : memref<2xf32, #tpu.memory_space<smem>>
    return
  }
}

</mosaic_0001>

<bundles_post_ra>
// kernel: distillation_forward.1
= control target key start
LH: loop header
LB: loop body
LE: loop exit
PB: predicated region body
PF: predicated region fallthrough
CT: control target
= control target key end

     0   :  { %9 = vsyncpa [#allocation3], 0  ;;  %s3254_s0 = inlined_call_operand.vmem [shape: bf16[8,1024], index: 0, kind: input, shape index: {}]   ;;  %s3255_s1 = inlined_call_operand.vmem [shape: bf16[8,128], index: 1, kind: input, shape index: {}]   ;;  %s3256_s2 = inlined_call_operand.vmem [shape: bf16[1024,256], index: 2, kind: input, shape index: {}]   ;;  %s3257_s3 = inlined_call_operand.hbm [shape: bf16[128,256], index: 3, kind: input, shape index: {}]   ;;  %s3258_s4 = inlined_call_operand.vmem [shape: f32[2], index: 4, kind: output, shape index: {}]  }
   0x1   :  { %10 = vsyncpa [#allocation4], 0  ;;  %s21_s17 = sshll.u32 %s3257_s3, 4  ;;  %s2363_s18 = smov [#allocation2]   ;;  %s22_s17 = int_to_ptr.hbm [resolvable:$true] %s21_s17 }
   0x2   :  { %s23_s19 = sshll.u32 %s2363_s18, 4  ;;  %s2364_s20 = smov 128   ;;  %s24_s19 = int_to_ptr.vmem [resolvable:$true] %s23_s19 }
   0x3   :  { %s2365_s21 = smov 8  }
   0x4   :  { %29 = dma.hbm_to_vmem [thread:$0]  %s22_s17, 2048, %s24_s19, [#allocation3], %s2364_s20, %s2364_s20, %s2365_s21  }
   0x5   :  { %2359 = dma.done.wait [#allocation3], 2048  }
   0x6   :  { %2360 = vsyncadd [#allocation3], 4294965248  ;;  %v1600_v0 = vld [vmem:[%s3256_s2 + $0x70] sm:$0xf]  ;;  %v2134_v1 = vld [vmem:[%s3256_s2 + $0x74] sm:$0xf0] }
   0x7   :  { %v1728_v2 = vld [vmem:[%s3256_s2 + $0x170] sm:$0xf]  ;;  %v1601_v3 = vor.u32 %v2134_v1, %v1600_v0  ;;  %v2166_v4 = vld [vmem:[%s3256_s2 + $0x174] sm:$0xf0]  ;;  %v1592_v9 = vld [vmem:[%s3256_s2 + $0x60] sm:$0xf] }
   0x8   :  { %v1792_v5 = vld [vmem:[%s3256_s2 + $0x1f0] sm:$0xf]  ;;  %v2182_v6 = vld [vmem:[%s3256_s2 + $0x1f4] sm:$0xf0]  ;;  %v1729_v7 = vor.u32 %v2166_v4, %v1728_v2  ;;  %v2132_v10 = vld [vmem:[%s3256_s2 + $0x64] sm:$0xf0] }
   0x9   :  { %v1793_v8 = vor.u32 %v2182_v6, %v1792_v5  ;;  %v1664_v11 = vld [vmem:[%s3256_s2 + $0xf0] sm:$0xf]  ;;  %834 = vmatpush.bf16.msra.mxu0 %v1601_v3  ;;  %v1593_v12 = vor.u32 %v2132_v10, %v1592_v9  ;;  %v2150_v13 = vld [vmem:[%s3256_s2 + $0xf4] sm:$0xf0]  ;;  %v1720_v14 = vld [vmem:[%s3256_s2 + $0x160] sm:$0xf] }
   0xa   :  { %v2164_v15 = vld [vmem:[%s3256_s2 + $0x164] sm:$0xf0]  ;;  %860 = vmatpush.bf16.msra.mxu2 %v1729_v7  ;;  %v1665_v16 = vor.u32 %v2150_v13, %v1664_v11  ;;  %v1784_v18 = vld [vmem:[%s3256_s2 + $0x1e0] sm:$0xf]  ;;  %v1584_v20 = vld [vmem:[%s3256_s2 + $0x50] sm:$0xf] }
   0xb   :  { %873 = vmatpush.bf16.msra.mxu3 %v1793_v8  ;;  %v1721_v17 = vor.u32 %v2164_v15, %v1720_v14  ;;  %v2180_v19 = vld [vmem:[%s3256_s2 + $0x1e4] sm:$0xf0]  ;;  %v2130_v22 = vld [vmem:[%s3256_s2 + $0x54] sm:$0xf0]  ;;  %v1656_v23 = vld [vmem:[%s3256_s2 + $0xe0] sm:$0xf] }
   0xc   :  { %v1785_v21 = vor.u32 %v2180_v19, %v1784_v18  ;;  %v2148_v24 = vld [vmem:[%s3256_s2 + $0xe4] sm:$0xf0]  ;;  %847 = vmatpush.bf16.msra.mxu1 %v1665_v16  ;;  %v1712_v26 = vld [vmem:[%s3256_s2 + $0x150] sm:$0xf]  ;;  %v2162_v27 = vld [vmem:[%s3256_s2 + $0x154] sm:$0xf0]  ;;  %v1585_v29 = vor.u32 %v2130_v22, %v1584_v20 }
   0xd   :  { %v1657_v25 = vor.u32 %v2148_v24, %v1656_v23  ;;  %v1776_v28 = vld [vmem:[%s3256_s2 + $0x1d0] sm:$0xf]  ;;  %835 = vmatpush.bf16.msra.mxu0 %v1593_v12  ;;  %v2178_v30 = vld [vmem:[%s3256_s2 + $0x1d4] sm:$0xf0]  ;;  %v1576_v31 = vld [vmem:[%s3256_s2 + $0x40] sm:$0xf]  ;;  %v1713_v33 = vor.u32 %v2162_v27, %v1712_v26 }
   0xe   :  { %v2128_v32 = vld [vmem:[%s3256_s2 + $0x44] sm:$0xf0]  ;;  %861 = vmatpush.bf16.msra.mxu2 %v1721_v17  ;;  %v1777_v34 = vor.u32 %v2178_v30, %v1776_v28  ;;  %v1648_v35 = vld [vmem:[%s3256_s2 + $0xd0] sm:$0xf]  ;;  %v2146_v36 = vld [vmem:[%s3256_s2 + $0xd4] sm:$0xf0] }
   0xf   :  { %874 = vmatpush.bf16.msra.mxu3 %v1785_v21  ;;  %v1704_v37 = vld [vmem:[%s3256_s2 + $0x140] sm:$0xf]  ;;  %v2160_v38 = vld [vmem:[%s3256_s2 + $0x144] sm:$0xf0]  ;;  %v1649_v41 = vor.u32 %v2146_v36, %v1648_v35  ;;  %v1577_v42 = vor.u32 %v2128_v32, %v1576_v31  ;;  %v1568_v47 = vld [vmem:[%s3256_s2 + $0x30] sm:$0xf] }
  0x10   :  { %v1768_v39 = vld [vmem:[%s3256_s2 + $0x1c0] sm:$0xf]  ;;  %v2176_v40 = vld [vmem:[%s3256_s2 + $0x1c4] sm:$0xf0]  ;;  %848 = vmatpush.bf16.msra.mxu1 %v1657_v25  ;;  %v1705_v45 = vor.u32 %v2160_v38, %v1704_v37  ;;  %v2126_v48 = vld [vmem:[%s3256_s2 + $0x34] sm:$0xf0] }
  0x11   :  { %836 = vmatpush.bf16.msra.mxu0 %v1585_v29  ;;  %v1640_v43 = vld [vmem:[%s3256_s2 + $0xc0] sm:$0xf]  ;;  %v2144_v44 = vld [vmem:[%s3256_s2 + $0xc4] sm:$0xf0]  ;;  %v1769_v46 = vor.u32 %v2176_v40, %v1768_v39  ;;  %v1696_v49 = vld [vmem:[%s3256_s2 + $0x130] sm:$0xf]  ;;  %v1569_v54 = vor.u32 %v2126_v48, %v1568_v47 }
  0x12   :  { %862 = vmatpush.bf16.msra.mxu2 %v1713_v33  ;;  %v2158_v50 = vld [vmem:[%s3256_s2 + $0x134] sm:$0xf0]  ;;  %v1760_v51 = vld [vmem:[%s3256_s2 + $0x1b0] sm:$0xf]  ;;  %v1641_v53 = vor.u32 %v2144_v44, %v1640_v43  ;;  %v1560_v59 = vld [vmem:[%s3256_s2 + $0x20] sm:$0xf] }
  0x13   :  { %875 = vmatpush.bf16.msra.mxu3 %v1777_v34  ;;  %v2174_v52 = vld [vmem:[%s3256_s2 + $0x1b4] sm:$0xf0]  ;;  %v1632_v55 = vld [vmem:[%s3256_s2 + $0xb0] sm:$0xf]  ;;  %v1697_v57 = vor.u32 %v2158_v50, %v1696_v49  ;;  %v2124_v60 = vld [vmem:[%s3256_s2 + $0x24] sm:$0xf0] }
  0x14   :  { %849 = vmatpush.bf16.msra.mxu1 %v1649_v41  ;;  %v2142_v56 = vld [vmem:[%s3256_s2 + $0xb4] sm:$0xf0]  ;;  %v1761_v58 = vor.u32 %v2174_v52, %v1760_v51  ;;  %v1688_v61 = vld [vmem:[%s3256_s2 + $0x120] sm:$0xf]  ;;  %v2156_v62 = vld [vmem:[%s3256_s2 + $0x124] sm:$0xf0]  ;;  %v1561_v2 = vor.u32 %v2124_v60, %v1560_v59 }
  0x15   :  { %837 = vmatpush.bf16.msra.mxu0 %v1577_v42  ;;  %v1752_v63 = vld [vmem:[%s3256_s2 + $0x1a0] sm:$0xf]  ;;  %v2172_v0 = vld [vmem:[%s3256_s2 + $0x1a4] sm:$0xf0]  ;;  %v1633_v1 = vor.u32 %v2142_v56, %v1632_v55  ;;  %v1689_v5 = vor.u32 %v2156_v62, %v1688_v61  ;;  %v1552_v7 = vld [vmem:[%s3256_s2 + $0x10] sm:$0xf] }
  0x16   :  { %863 = vmatpush.bf16.msra.mxu2 %v1705_v45  ;;  %v1624_v3 = vld [vmem:[%s3256_s2 + $0xa0] sm:$0xf]  ;;  %v2140_v4 = vld [vmem:[%s3256_s2 + $0xa4] sm:$0xf0]  ;;  %v1753_v6 = vor.u32 %v2172_v0, %v1752_v63  ;;  %v2122_v8 = vld [vmem:[%s3256_s2 + $0x14] sm:$0xf0] }
  0x17   :  { %876 = vmatpush.bf16.msra.mxu3 %v1769_v46  ;;  %v1680_v9 = vld [vmem:[%s3256_s2 + $0x110] sm:$0xf]  ;;  %v2154_v10 = vld [vmem:[%s3256_s2 + $0x114] sm:$0xf0]  ;;  %v1625_v13 = vor.u32 %v2140_v4, %v1624_v3  ;;  %v1544_v14 = vld [vmem:[%s3256_s2] sm:$0xf]  ;;  %v1553_v15 = vor.u32 %v2122_v8, %v1552_v7 }
  0x18   :  { %850 = vmatpush.bf16.msra.mxu1 %v1641_v53  ;;  %v1744_v11 = vld [vmem:[%s3256_s2 + $0x190] sm:$0xf]  ;;  %v2170_v12 = vld [vmem:[%s3256_s2 + $0x194] sm:$0xf0]  ;;  %v2120_v16 = vld [vmem:[%s3256_s2 + $0x4] sm:$0xf0]  ;;  %v1681_v19 = vor.u32 %v2154_v10, %v1680_v9 }
  0x19   :  { %838 = vmatpush.bf16.msra.mxu0 %v1569_v54  ;;  %v1616_v17 = vld [vmem:[%s3256_s2 + $0x90] sm:$0xf]  ;;  %v2138_v18 = vld [vmem:[%s3256_s2 + $0x94] sm:$0xf0]  ;;  %v1745_v20 = vor.u32 %v2170_v12, %v1744_v11  ;;  %v1672_v21 = vld [vmem:[%s3256_s2 + $0x100] sm:$0xf]  ;;  %v1545_v31 = vor.u32 %v2120_v16, %v1544_v14 }
  0x1a   :  { %864 = vmatpush.bf16.msra.mxu2 %v1697_v57  ;;  %v2152_v22 = vld [vmem:[%s3256_s2 + $0x104] sm:$0xf0]  ;;  %v1856_v23 = vld [vmem:[%s3256_s2 + $0x270] sm:$0xf]  ;;  %v2198_v24 = vld [vmem:[%s3256_s2 + $0x274] sm:$0xf0]  ;;  %v1617_v27 = vor.u32 %v2138_v18, %v1616_v17 }
  0x1b   :  { %877 = vmatpush.bf16.msra.mxu3 %v1761_v58  ;;  %v1984_v25 = vld [vmem:[%s3256_s2 + $0x370] sm:$0xf]  ;;  %v2230_v26 = vld [vmem:[%s3256_s2 + $0x374] sm:$0xf0]  ;;  %v1736_v28 = vld [vmem:[%s3256_s2 + $0x180] sm:$0xf]  ;;  %v1673_v35 = vor.u32 %v2152_v22, %v1672_v21  ;;  %v1857_v36 = vor.u32 %v2198_v24, %v1856_v23 }
  0x1c   :  { %851 = vmatpush.bf16.msra.mxu1 %v1633_v1  ;;  %v2168_v29 = vld [vmem:[%s3256_s2 + $0x184] sm:$0xf0]  ;;  %v2048_v30 = vld [vmem:[%s3256_s2 + $0x3f0] sm:$0xf]  ;;  %v2246_v32 = vld [vmem:[%s3256_s2 + $0x3f4] sm:$0xf0]  ;;  %v1985_v39 = vor.u32 %v2230_v26, %v1984_v25 }
  0x1d   :  { %839 = vmatpush.bf16.msra.mxu0 %v1561_v2  ;;  %v1608_v33 = vld [vmem:[%s3256_s2 + $0x80] sm:$0xf]  ;;  %v2136_v34 = vld [vmem:[%s3256_s2 + $0x84] sm:$0xf0]  ;;  %v1920_v37 = vld [vmem:[%s3256_s2 + $0x2f0] sm:$0xf]  ;;  %v1737_v40 = vor.u32 %v2168_v29, %v1736_v28  ;;  %v2049_v43 = vor.u32 %v2246_v32, %v2048_v30 }
  0x1e   :  { %865 = vmatpush.bf16.msra.mxu2 %v1689_v5  ;;  %v2214_v38 = vld [vmem:[%s3256_s2 + $0x2f4] sm:$0xf0]  ;;  %v1848_v41 = vld [vmem:[%s3256_s2 + $0x260] sm:$0xf]  ;;  %v2196_v42 = vld [vmem:[%s3256_s2 + $0x264] sm:$0xf0]  ;;  %v1609_v44 = vor.u32 %v2136_v34, %v1608_v33 }
  0x1f   :  { %878 = vmatpush.bf16.msra.mxu3 %v1753_v6  ;;  %v1976_v45 = vld [vmem:[%s3256_s2 + $0x360] sm:$0xf]  ;;  %v2228_v46 = vld [vmem:[%s3256_s2 + $0x364] sm:$0xf0]  ;;  %v1921_v47 = vor.u32 %v2214_v38, %v1920_v37  ;;  %v1849_v50 = vor.u32 %v2196_v42, %v1848_v41  ;;  %v1840_v55 = vld [vmem:[%s3256_s2 + $0x250] sm:$0xf] }
  0x20   :  { %852 = vmatpush.bf16.msra.mxu1 %v1625_v13  ;;  %v2040_v48 = vld [vmem:[%s3256_s2 + $0x3e0] sm:$0xf]  ;;  %v2244_v49 = vld [vmem:[%s3256_s2 + $0x3e4] sm:$0xf0]  ;;  %v1977_v54 = vor.u32 %v2228_v46, %v1976_v45  ;;  %v2194_v56 = vld [vmem:[%s3256_s2 + $0x254] sm:$0xf0] }
  0x21   :  { %840 = vmatpush.bf16.msra.mxu0 %v1553_v15  ;;  %v1912_v51 = vld [vmem:[%s3256_s2 + $0x2e0] sm:$0xf]  ;;  %v2212_v52 = vld [vmem:[%s3256_s2 + $0x2e4] sm:$0xf0]  ;;  %v2041_v60 = vor.u32 %v2244_v49, %v2040_v48  ;;  %v1968_v61 = vld [vmem:[%s3256_s2 + $0x350] sm:$0xf]  ;;  %v1841_v6 = vor.u32 %v2194_v56, %v1840_v55 }
  0x22   :  { %866 = vmatpush.bf16.msra.mxu2 %v1681_v19  ;;  %v35_v53 = vld [vmem:[%s3254_s0 + $0x8] sm:$0xff]  ;;  %v34_v58 = vld [vmem:[%s3254_s0] sm:$0xff]  ;;  %v2226_v62 = vld [vmem:[%s3256_s2 + $0x354] sm:$0xf0]  ;;  %v1913_v1 = vor.u32 %v2212_v52, %v1912_v51  ;;  %vm1314_vm10 = vcmask 64512   ;;  %vm1367_vm14 = vcmask 57344  }
  0x23   :  { %879 = vmatpush.bf16.msra.mxu3 %v1745_v20  ;;  %v172_v57 = vunpack.c.l.b16 %v35_v53  ;;  %v173_v59 = vunpack.c.h.b16 %v35_v53  ;;  %v170_v63 = vunpack.c.l.b16 %v34_v58  ;;  %v171_v0 = vunpack.c.h.b16 %v34_v58  ;;  %v2032_v2 = vld [vmem:[%s3256_s2 + $0x3d0] sm:$0xf]  ;;  %v2242_v3 = vld [vmem:[%s3256_s2 + $0x3d4] sm:$0xf0]  ;;  %v1832_v12 = vld [vmem:[%s3256_s2 + $0x240] sm:$0xf] }
  0x24   :  { %853 = vmatpush.bf16.msra.mxu1 %v1617_v27  ;;  %v1904_v7 = vld [vmem:[%s3256_s2 + $0x2d0] sm:$0xf]  ;;  %v2210_v8 = vld [vmem:[%s3256_s2 + $0x2d4] sm:$0xf0]  ;;  %v1969_v11 = vor.u32 %v2226_v62, %v1968_v61  ;;  %v2192_v13 = vld [vmem:[%s3256_s2 + $0x244] sm:$0xf0]  ;;  %v2033_v14 = vor.u32 %v2242_v3, %v2032_v2 }
  0x25   :  { %841 = vmatpush.bf16.msra.mxu0 %v1545_v31  ;;  %v2661_v4 = vpack.c.b16 %v172_v57, %v172_v57  ;;  %v2663_v5 = vpack.c.b16 %v173_v59, %v173_v59  ;;  %v2671_v9 = vpack.c.b16 %v170_v63, %v170_v63  ;;  %v2673_v10 = vpack.c.b16 %v171_v0, %v171_v0  ;;  %v1960_v15 = vld [vmem:[%s3256_s2 + $0x340] sm:$0xf]  ;;  %v2224_v16 = vld [vmem:[%s3256_s2 + $0x344] sm:$0xf0]  ;;  %v1824_v24 = vld [vmem:[%s3256_s2 + $0x230] sm:$0xf] }
  0x26   :  { %867 = vmatpush.bf16.msra.mxu2 %v1673_v35  ;;  %v1905_v17 = vor.u32 %v2210_v8, %v1904_v7  ;;  %v2024_v18 = vld [vmem:[%s3256_s2 + $0x3c0] sm:$0xf]  ;;  %v2240_v19 = vld [vmem:[%s3256_s2 + $0x3c4] sm:$0xf0]  ;;  %v1833_v20 = vor.u32 %v2192_v13, %v1832_v12  ;;  %v1961_v23 = vor.u32 %v2224_v16, %v1960_v15  ;;  %v2190_v25 = vld [vmem:[%s3256_s2 + $0x234] sm:$0xf0] }
  0x27   :  { %880 = vmatpush.bf16.msra.mxu3 %v1737_v40  ;;  %v1896_v21 = vld [vmem:[%s3256_s2 + $0x2c0] sm:$0xf]  ;;  %v2208_v22 = vld [vmem:[%s3256_s2 + $0x2c4] sm:$0xf0]  ;;  %v2025_v26 = vor.u32 %v2240_v19, %v2024_v18  ;;  %v1952_v27 = vld [vmem:[%s3256_s2 + $0x330] sm:$0xf]  ;;  %v1825_v32 = vor.u32 %v2190_v25, %v1824_v24 }
  0x28   :  { %854 = vmatpush.bf16.msra.mxu1 %v1609_v44  ;;  %842 = vmatmul.bf16.vlgmr.msra.gmra.mxu0 %v2671_v9  ;;  %v2222_v28 = vld [vmem:[%s3256_s2 + $0x334] sm:$0xf0]  ;;  %v1897_v29 = vor.u32 %v2208_v22, %v1896_v21  ;;  %v2016_v30 = vld [vmem:[%s3256_s2 + $0x3b0] sm:$0xf]  ;;  %v2188_v37 = vld [vmem:[%s3256_s2 + $0x224] sm:$0xf0] }
  0x29   :  { %886 = vmatpush.bf16.msrb.mxu0 %v1857_v36  ;;  %868 = vmatmul.bf16.vlgmr.msra.gmra.mxu2 %v2661_v4  ;;  %v2238_v31 = vld [vmem:[%s3256_s2 + $0x3b4] sm:$0xf0]  ;;  %v1888_v33 = vld [vmem:[%s3256_s2 + $0x2b0] sm:$0xf]  ;;  %v1953_v35 = vor.u32 %v2222_v28, %v1952_v27  ;;  %v1816_v36 = vld [vmem:[%s3256_s2 + $0x220] sm:$0xf] }
  0x2a   :  { %912 = vmatpush.bf16.msrb.mxu2 %v1985_v39  ;;  %881 = vmatmul.bf16.vlgmr.msra.gmra.mxu3 %v2663_v5  ;;  %v2206_v34 = vld [vmem:[%s3256_s2 + $0x2b4] sm:$0xf0]  ;;  %v2017_v38 = vor.u32 %v2238_v31, %v2016_v30  ;;  %v1944_v39 = vld [vmem:[%s3256_s2 + $0x320] sm:$0xf]  ;;  %v2220_v40 = vld [vmem:[%s3256_s2 + $0x324] sm:$0xf0]  ;;  %v1817_v44 = vor.u32 %v2188_v37, %v1816_v36 }
  0x2b   :  { %925 = vmatpush.bf16.msrb.mxu3 %v2049_v43  ;;  %855 = vmatmul.bf16.vlgmr.msra.gmra.mxu1 %v2673_v10  ;;  %v1889_v41 = vor.u32 %v2206_v34, %v1888_v33  ;;  %v2008_v42 = vld [vmem:[%s3256_s2 + $0x3a0] sm:$0xf]  ;;  %v2236_v43 = vld [vmem:[%s3256_s2 + $0x3a4] sm:$0xf0]  ;;  %v1808_v48 = vld [vmem:[%s3256_s2 + $0x210] sm:$0xf] }
  0x2c   :  { %899 = vmatpush.bf16.msrb.mxu1 %v1921_v47  ;;  %v1880_v45 = vld [vmem:[%s3256_s2 + $0x2a0] sm:$0xf]  ;;  %v2204_v46 = vld [vmem:[%s3256_s2 + $0x2a4] sm:$0xf0]  ;;  %v1945_v47 = vor.u32 %v2220_v40, %v1944_v39  ;;  %v2186_v49 = vld [vmem:[%s3256_s2 + $0x214] sm:$0xf0]  ;;  %v2009_v51 = vor.u32 %v2236_v43, %v2008_v42 }
  0x2d   :  { %887 = vmatpush.bf16.msrb.mxu0 %v1849_v50  ;;  %v1936_v50 = vld [vmem:[%s3256_s2 + $0x310] sm:$0xf]  ;;  %v2218_v52 = vld [vmem:[%s3256_s2 + $0x314] sm:$0xf0]  ;;  %v1881_v55 = vor.u32 %v2204_v46, %v1880_v45  ;;  %v1800_v56 = vld [vmem:[%s3256_s2 + $0x200] sm:$0xf]  ;;  %v1809_v59 = vor.u32 %v2186_v49, %v1808_v48 }
  0x2e   :  { %913 = vmatpush.bf16.msrb.mxu2 %v1977_v54  ;;  %v2000_v53 = vld [vmem:[%s3256_s2 + $0x390] sm:$0xf]  ;;  %v2234_v54 = vld [vmem:[%s3256_s2 + $0x394] sm:$0xf0]  ;;  %v2184_v57 = vld [vmem:[%s3256_s2 + $0x204] sm:$0xf0]  ;;  %v1937_v63 = vor.u32 %v2218_v52, %v1936_v50 }
  0x2f   :  { %926 = vmatpush.bf16.msrb.mxu3 %v2041_v60  ;;  %v1872_v58 = vld [vmem:[%s3256_s2 + $0x290] sm:$0xf]  ;;  %v2202_v60 = vld [vmem:[%s3256_s2 + $0x294] sm:$0xf0]  ;;  %v1928_v61 = vld [vmem:[%s3256_s2 + $0x300] sm:$0xf]  ;;  %v2001_v3 = vor.u32 %v2234_v54, %v2000_v53  ;;  %v1801_v15 = vor.u32 %v2184_v57, %v1800_v56 }
  0x30   :  { %900 = vmatpush.bf16.msrb.mxu1 %v1913_v1  ;;  %v2216_v62 = vld [vmem:[%s3256_s2 + $0x304] sm:$0xf0]  ;;  %v2133_v0 = vld [vmem:[%s3256_s2 + $0x74] sm:$0xf]  ;;  %v1602_v1 = vld [vmem:[%s3256_s2 + $0x78] sm:$0xf0] }
  0x31   :  { %888 = vmatpush.bf16.msrb.mxu0 %v1841_v6  ;;  %v37_v2 = vld [vmem:[%s3254_s0 + $0x18] sm:$0xff]  ;;  %v2165_v6 = vld [vmem:[%s3256_s2 + $0x174] sm:$0xf]  ;;  %v1992_v8 = vld [vmem:[%s3256_s2 + $0x380] sm:$0xf]  ;;  %v1605_v21 = vor.u32 %v2133_v0, %v1602_v1  ;;  %vm1355_vm15 = vcmask 7168  }
  0x32   :  { %914 = vmatpush.bf16.msrb.mxu2 %v1969_v11  ;;  %v1730_v7 = vld [vmem:[%s3256_s2 + $0x178] sm:$0xf0]  ;;  %v1873_v11 = vor.u32 %v2202_v60, %v1872_v58  ;;  %v2232_v12 = vld [vmem:[%s3256_s2 + $0x384] sm:$0xf0]  ;;  %v2181_v13 = vld [vmem:[%s3256_s2 + $0x1f4] sm:$0xf]  ;;  %v176_v19 = vunpack.c.l.b16 %v37_v2  ;;  %v177_v24 = vunpack.c.h.b16 %v37_v2 }
  0x33   :  { %927 = vmatpush.bf16.msrb.mxu3 %v2033_v14  ;;  %v36_v14 = vld [vmem:[%s3254_s0 + $0x10] sm:$0xff]  ;;  %v1794_v16 = vld [vmem:[%s3256_s2 + $0x1f8] sm:$0xf0]  ;;  %v2200_v18 = vld [vmem:[%s3256_s2 + $0x284] sm:$0xf0]  ;;  %v1733_v25 = vor.u32 %v2165_v6, %v1730_v7  ;;  %s1531_s14 = sshll.u32 %s3258_s4, 4  ;;  %s1532_s14 = int_to_ptr.vmem [resolvable:$true] %s1531_s14 }
  0x34   :  { %901 = vmatpush.bf16.msrb.mxu1 %v1905_v17  ;;  %v1864_v17 = vld [vmem:[%s3256_s2 + $0x280] sm:$0xf]  ;;  %v2149_v22 = vld [vmem:[%s3256_s2 + $0xf4] sm:$0xf]  ;;  %v2131_v27 = vld [vmem:[%s3256_s2 + $0x64] sm:$0xf]  ;;  %v1797_v30 = vor.u32 %v2181_v13, %v1794_v16  ;;  %v175_v34 = vunpack.c.h.b16 %v36_v14  ;;  %v2849_v40 = vpack.c.b16 %v177_v24, %v177_v24 }
  0x35   :  { %889 = vmatpush.bf16.msrb.mxu0 %v1833_v20  ;;  %v1929_v20 = vor.u32 %v2216_v62, %v1928_v61  ;;  %v1594_v28 = vld [vmem:[%s3256_s2 + $0x68] sm:$0xf0]  ;;  %v1865_v31 = vor.u32 %v2200_v18, %v1864_v17  ;;  %v2179_v37 = vld [vmem:[%s3256_s2 + $0x1e4] sm:$0xf]  ;;  %v2129_v45 = vld [vmem:[%s3256_s2 + $0x54] sm:$0xf] }
  0x36   :  { %915 = vmatpush.bf16.msrb.mxu2 %v1961_v23  ;;  %v1666_v23 = vld [vmem:[%s3256_s2 + $0xf8] sm:$0xf0]  ;;  %v1722_v33 = vld [vmem:[%s3256_s2 + $0x168] sm:$0xf0]  ;;  %v1597_v39 = vor.u32 %v2131_v27, %v1594_v28  ;;  %v2865_v48 = vpack.c.b16 %v175_v34, %v175_v34  ;;  %v2161_v49 = vld [vmem:[%s3256_s2 + $0x154] sm:$0xf] }
  0x37   :  { %928 = vmatpush.bf16.msrb.mxu3 %v2025_v26  ;;  %v1993_v26 = vor.u32 %v2232_v12, %v1992_v8  ;;  %v1669_v36 = vor.u32 %v2149_v22, %v1666_v23  ;;  %v1658_v42 = vld [vmem:[%s3256_s2 + $0xe8] sm:$0xf0]  ;;  %v1586_v46 = vld [vmem:[%s3256_s2 + $0x58] sm:$0xf0]  ;;  %v2177_v52 = vld [vmem:[%s3256_s2 + $0x1d4] sm:$0xf] }
  0x38   :  { %902 = vmatpush.bf16.msrb.mxu1 %v1897_v29  ;;  %v174_v29 = vunpack.c.l.b16 %v36_v14  ;;  %v1714_v50 = vld [vmem:[%s3256_s2 + $0x158] sm:$0xf0]  ;;  %v1589_v54 = vor.u32 %v2129_v45, %v1586_v46  ;;  %v2127_v58 = vld [vmem:[%s3256_s2 + $0x44] sm:$0xf]  ;;  %v1706_v62 = vld [vmem:[%s3256_s2 + $0x148] sm:$0xf0] }
  0x39   :  { %890 = vmatpush.bf16.msrb.mxu0 %v1825_v32  ;;  %v2163_v32 = vld [vmem:[%s3256_s2 + $0x164] sm:$0xf]  ;;  %v1778_v53 = vld [vmem:[%s3256_s2 + $0x1d8] sm:$0xf0]  ;;  %v1717_v57 = vor.u32 %v2161_v49, %v1714_v50  ;;  %v1770_v1 = vld [vmem:[%s3256_s2 + $0x1c8] sm:$0xf0] }
  0x3a   :  { %916 = vmatpush.bf16.msrb.mxu2 %v1953_v35  ;;  %v2841_v35 = vpack.c.b16 %v176_v19, %v176_v19  ;;  %v1725_v43 = vor.u32 %v2163_v32, %v1722_v33  ;;  %v1650_v56 = vld [vmem:[%s3256_s2 + $0xd8] sm:$0xf0]  ;;  %v1781_v60 = vor.u32 %v2177_v52, %v1778_v53  ;;  %v2159_v61 = vld [vmem:[%s3256_s2 + $0x144] sm:$0xf]  ;;  %v1642_v6 = vld [vmem:[%s3256_s2 + $0xc8] sm:$0xf0] }
  0x3b   :  { %929 = vmatpush.bf16.msrb.mxu3 %v2017_v38  ;;  %v1786_v38 = vld [vmem:[%s3256_s2 + $0x1e8] sm:$0xf0]  ;;  %v2175_v0 = vld [vmem:[%s3256_s2 + $0x1c4] sm:$0xf]  ;;  %v1709_v7 = vor.u32 %v2159_v61, %v1706_v62  ;;  %v2125_v8 = vld [vmem:[%s3256_s2 + $0x34] sm:$0xf] }
  0x3c   :  { %903 = vmatpush.bf16.msrb.mxu1 %v1889_v41  ;;  %v2147_v41 = vld [vmem:[%s3256_s2 + $0xe4] sm:$0xf]  ;;  %v1773_v12 = vor.u32 %v2175_v0, %v1770_v1  ;;  %v2157_v13 = vld [vmem:[%s3256_s2 + $0x134] sm:$0xf]  ;;  %v1698_v14 = vld [vmem:[%s3256_s2 + $0x138] sm:$0xf0] }
  0x3d   :  { %891 = vmatpush.bf16.msrb.mxu0 %v1817_v44  ;;  %v2857_v44 = vpack.c.b16 %v174_v29, %v174_v29  ;;  %v2173_v16 = vld [vmem:[%s3256_s2 + $0x1b4] sm:$0xf]  ;;  %v1762_v17 = vld [vmem:[%s3256_s2 + $0x1b8] sm:$0xf0]  ;;  %v2123_v22 = vld [vmem:[%s3256_s2 + $0x24] sm:$0xf] }
  0x3e   :  { %917 = vmatpush.bf16.msrb.mxu2 %v1945_v47  ;;  %v1789_v47 = vor.u32 %v2179_v37, %v1786_v38  ;;  %v2141_v19 = vld [vmem:[%s3256_s2 + $0xb4] sm:$0xf]  ;;  %v1562_v23 = vld [vmem:[%s3256_s2 + $0x28] sm:$0xf0]  ;;  %v1765_v24 = vor.u32 %v2173_v16, %v1762_v17  ;;  %v2171_v28 = vld [vmem:[%s3256_s2 + $0x1a4] sm:$0xf] }
  0x3f   :  { %930 = vmatpush.bf16.msrb.mxu3 %v2009_v51  ;;  %v1661_v51 = vor.u32 %v2147_v41, %v1658_v42  ;;  %v1754_v29 = vld [vmem:[%s3256_s2 + $0x1a8] sm:$0xf0]  ;;  %v2121_v34 = vld [vmem:[%s3256_s2 + $0x14] sm:$0xf]  ;;  %v2119_v45 = vld [vmem:[%s3256_s2 + $0x4] sm:$0xf] }
  0x40   :  { %904 = vmatpush.bf16.msrb.mxu1 %v1881_v55  ;;  %v2145_v55 = vld [vmem:[%s3256_s2 + $0xd4] sm:$0xf]  ;;  %v1626_v32 = vld [vmem:[%s3256_s2 + $0xa8] sm:$0xf0]  ;;  %v1757_v37 = vor.u32 %v2171_v28, %v1754_v29  ;;  %v1618_v50 = vld [vmem:[%s3256_s2 + $0x98] sm:$0xf0] }
  0x41   :  { %892 = vmatpush.bf16.msrb.mxu0 %v1809_v59  ;;  %v1578_v59 = vld [vmem:[%s3256_s2 + $0x48] sm:$0xf0]  ;;  %v2153_v38 = vld [vmem:[%s3256_s2 + $0x114] sm:$0xf]  ;;  %v2151_v52 = vld [vmem:[%s3256_s2 + $0x104] sm:$0xf] }
  0x42   :  { %918 = vmatpush.bf16.msrb.mxu2 %v1937_v63  ;;  %v1653_v63 = vor.u32 %v2145_v55, %v1650_v56  ;;  %v1581_v2 = vor.u32 %v2127_v58, %v1578_v59  ;;  %v2169_v42 = vld [vmem:[%s3256_s2 + $0x194] sm:$0xf]  ;;  %v1674_v53 = vld [vmem:[%s3256_s2 + $0x108] sm:$0xf0]  ;;  %v1858_v56 = vld [vmem:[%s3256_s2 + $0x278] sm:$0xf0] }
  0x43   :  { %931 = vmatpush.bf16.msrb.mxu3 %v2001_v3  ;;  %v2143_v3 = vld [vmem:[%s3256_s2 + $0xc4] sm:$0xf]  ;;  %v2137_v49 = vld [vmem:[%s3256_s2 + $0x94] sm:$0xf]  ;;  %v1986_v58 = vld [vmem:[%s3256_s2 + $0x378] sm:$0xf0] }
  0x44   :  { %905 = vmatpush.bf16.msrb.mxu1 %v1873_v11  ;;  %v1570_v11 = vld [vmem:[%s3256_s2 + $0x38] sm:$0xf0]  ;;  %v1621_v59 = vor.u32 %v2137_v49, %v1618_v50  ;;  %v1738_v61 = vld [vmem:[%s3256_s2 + $0x188] sm:$0xf0]  ;;  %v2245_v62 = vld [vmem:[%s3256_s2 + $0x3f4] sm:$0xf] }
  0x45   :  { %893 = vmatpush.bf16.msrb.mxu0 %v1801_v15  ;;  %v1645_v15 = vor.u32 %v2143_v3, %v1642_v6  ;;  %v1573_v18 = vor.u32 %v2125_v8, %v1570_v11  ;;  %v2050_v0 = vld [vmem:[%s3256_s2 + $0x3f8] sm:$0xf0]  ;;  %v2135_v1 = vld [vmem:[%s3256_s2 + $0x84] sm:$0xf]  ;;  %v1677_v3 = vor.u32 %v2151_v52, %v1674_v53  ;;  %v2225_v29 = vld [vmem:[%s3256_s2 + $0x354] sm:$0xf] }
  0x46   :  { %919 = vmatpush.bf16.msrb.mxu2 %v1929_v20  ;;  %v1634_v20 = vld [vmem:[%s3256_s2 + $0xb8] sm:$0xf0]  ;;  %v2227_v17 = vld [vmem:[%s3256_s2 + $0x364] sm:$0xf]  ;;  %v2189_v50 = vld [vmem:[%s3256_s2 + $0x234] sm:$0xf] }
  0x47   :  { %932 = vmatpush.bf16.msrb.mxu3 %v1993_v26  ;;  %v1690_v26 = vld [vmem:[%s3256_s2 + $0x128] sm:$0xf0]  ;;  %v1637_v27 = vor.u32 %v2141_v19, %v1634_v20  ;;  %v1922_v8 = vld [vmem:[%s3256_s2 + $0x2f8] sm:$0xf0]  ;;  %v2243_v20 = vld [vmem:[%s3256_s2 + $0x3e4] sm:$0xf] }
  0x48   :  { %906 = vmatpush.bf16.msrb.mxu1 %v1865_v31  ;;  %894 = vmatmul.bf16.vlgmr.msrb.gmra.mxu0 %v2857_v44  ;;  %v2139_v31 = vld [vmem:[%s3256_s2 + $0xa4] sm:$0xf]  ;;  %v2221_v53 = vld [vmem:[%s3256_s2 + $0x334] sm:$0xf]  ;;  %s2368_s17 = smov [#allocation5]  }
  0x49   :  { %938 = vmatpush.bf16.msra.mxu0 %v1605_v21  ;;  %920 = vmatmul.bf16.vlgmr.msrb.gmra.mxu2 %v2841_v35  ;;  %v1701_v21 = vor.u32 %v2157_v13, %v1698_v14  ;;  %v1629_v41 = vor.u32 %v2139_v31, %v1626_v32  ;;  %v2195_v13 = vld [vmem:[%s3256_s2 + $0x264] sm:$0xf]  ;;  %v1850_v14 = vld [vmem:[%s3256_s2 + $0x268] sm:$0xf0]  ;;  %v2241_v32 = vld [vmem:[%s3256_s2 + $0x3d4] sm:$0xf] }
  0x4a   :  { %964 = vmatpush.bf16.msra.mxu2 %v1733_v25  ;;  %933 = vmatmul.bf16.vlgmr.msrb.gmra.mxu3 %v2849_v40  ;;  %v2155_v25 = vld [vmem:[%s3256_s2 + $0x124] sm:$0xf] }
  0x4b   :  { %977 = vmatpush.bf16.msra.mxu3 %v1797_v30  ;;  %907 = vmatmul.bf16.vlgmr.msrb.gmra.mxu1 %v2865_v48  ;;  %v1565_v30 = vor.u32 %v2123_v22, %v1562_v23  ;;  %v1693_v33 = vor.u32 %v2155_v25, %v1690_v26  ;;  %v1853_v22 = vor.u32 %v2195_v13, %v1850_v14  ;;  %v2211_v23 = vld [vmem:[%s3256_s2 + $0x2e4] sm:$0xf]  ;;  %v2193_v26 = vld [vmem:[%s3256_s2 + $0x254] sm:$0xf] }
  0x4c   :  { %951 = vmatpush.bf16.msra.mxu1 %v1669_v36  ;;  %v1554_v36 = vld [vmem:[%s3256_s2 + $0x18] sm:$0xf0]  ;;  %v2185_v14 = vld [vmem:[%s3256_s2 + $0x214] sm:$0xf] }
  0x4d   :  { %939 = vmatpush.bf16.msra.mxu0 %v1597_v39  ;;  %v1682_v39 = vld [vmem:[%s3256_s2 + $0x118] sm:$0xf0]  ;;  %v1557_v46 = vor.u32 %v2121_v34, %v1554_v36  ;;  %v2209_v36 = vld [vmem:[%s3256_s2 + $0x2d4] sm:$0xf] }
  0x4e   :  { %965 = vmatpush.bf16.msra.mxu2 %v1725_v43  ;;  %v1746_v43 = vld [vmem:[%s3256_s2 + $0x198] sm:$0xf0] }
  0x4f   :  { %978 = vmatpush.bf16.msra.mxu3 %v1789_v47  ;;  %v1546_v47 = vld [vmem:[%s3256_s2 + $0x8] sm:$0xf0]  ;;  %v1749_v55 = vor.u32 %v2169_v42, %v1746_v43  ;;  %v2223_v42 = vld [vmem:[%s3256_s2 + $0x344] sm:$0xf] }
  0x50   :  { %952 = vmatpush.bf16.msra.mxu1 %v1661_v51  ;;  %v1685_v51 = vor.u32 %v2153_v38, %v1682_v39  ;;  %v2191_v39 = vld [vmem:[%s3256_s2 + $0x244] sm:$0xf] }
  0x51   :  { %940 = vmatpush.bf16.msra.mxu0 %v1589_v54  ;;  %v2197_v54 = vld [vmem:[%s3256_s2 + $0x274] sm:$0xf] }
  0x52   :  { %966 = vmatpush.bf16.msra.mxu2 %v1717_v57  ;;  %v2229_v57 = vld [vmem:[%s3256_s2 + $0x374] sm:$0xf]  ;;  %v1861_v6 = vor.u32 %v2197_v54, %v1858_v56  ;;  %v1954_v54 = vld [vmem:[%s3256_s2 + $0x338] sm:$0xf0] }
  0x53   :  { %979 = vmatpush.bf16.msra.mxu3 %v1781_v60  ;;  %v2167_v60 = vld [vmem:[%s3256_s2 + $0x184] sm:$0xf]  ;;  %v1989_v11 = vor.u32 %v2229_v57, %v1986_v58  ;;  %v2237_v56 = vld [vmem:[%s3256_s2 + $0x3b4] sm:$0xf]  ;;  %v2018_v57 = vld [vmem:[%s3256_s2 + $0x3b8] sm:$0xf0] }
  0x54   :  { %953 = vmatpush.bf16.msra.mxu1 %v1653_v63  ;;  %v1549_v63 = vor.u32 %v2119_v45, %v1546_v47  ;;  %v2239_v45 = vld [vmem:[%s3256_s2 + $0x3c4] sm:$0xf] }
  0x55   :  { %941 = vmatpush.bf16.msra.mxu0 %v1581_v2  ;;  %v1610_v2 = vld [vmem:[%s3256_s2 + $0x88] sm:$0xf0]  ;;  %v2207_v47 = vld [vmem:[%s3256_s2 + $0x2c4] sm:$0xf] }
  0x56   :  { %967 = vmatpush.bf16.msra.mxu2 %v1709_v7  ;;  %v2213_v7 = vld [vmem:[%s3256_s2 + $0x2f4] sm:$0xf]  ;;  %v1613_v16 = vor.u32 %v2135_v1, %v1610_v2  ;;  %v2219_v1 = vld [vmem:[%s3256_s2 + $0x324] sm:$0xf]  ;;  %v1946_v2 = vld [vmem:[%s3256_s2 + $0x328] sm:$0xf0] }
  0x57   :  { %980 = vmatpush.bf16.msra.mxu3 %v1773_v12  ;;  %v1741_v12 = vor.u32 %v2167_v60, %v1738_v61  ;;  %v1925_v19 = vor.u32 %v2213_v7, %v1922_v8  ;;  %v1890_v60 = vld [vmem:[%s3256_s2 + $0x2b8] sm:$0xf0]  ;;  %v1957_v61 = vor.u32 %v2221_v53, %v1954_v54  ;;  %v2010_v7 = vld [vmem:[%s3256_s2 + $0x3a8] sm:$0xf0]  ;;  %v1949_v13 = vor.u32 %v2219_v1, %v1946_v2  ;;  %v2254_v53 = vld [vmem:[#allocation2 + $0x34] sm:$0xf0] }
  0x58   :  { %954 = vmatpush.bf16.msra.mxu1 %v1645_v15  ;;  %v2053_v15 = vor.u32 %v2245_v62, %v2050_v0  ;;  %v2187_v62 = vld [vmem:[%s3256_s2 + $0x224] sm:$0xf]  ;;  %v2021_v0 = vor.u32 %v2237_v56, %v2018_v57  ;;  %v2252_v56 = vld [vmem:[#allocation2 + $0x24] sm:$0xf0]  ;;  %v2064_v57 = vld [vmem:[#allocation2 + $0x10] sm:$0xf] }
  0x59   :  { %942 = vmatpush.bf16.msra.mxu0 %v1573_v18  ;;  %v1978_v18 = vld [vmem:[%s3256_s2 + $0x368] sm:$0xf0] }
  0x5a   :  { %968 = vmatpush.bf16.msra.mxu2 %v1701_v21  ;;  %v2042_v21 = vld [vmem:[%s3256_s2 + $0x3e8] sm:$0xf0]  ;;  %v1981_v25 = vor.u32 %v2227_v17, %v1978_v18  ;;  %v2217_v17 = vld [vmem:[%s3256_s2 + $0x314] sm:$0xf]  ;;  %v1938_v18 = vld [vmem:[%s3256_s2 + $0x318] sm:$0xf0] }
  0x5b   :  { %981 = vmatpush.bf16.msra.mxu3 %v1765_v24  ;;  %v1914_v24 = vld [vmem:[%s3256_s2 + $0x2e8] sm:$0xf0]  ;;  %v2045_v28 = vor.u32 %v2243_v20, %v2042_v21  ;;  %v2233_v20 = vld [vmem:[%s3256_s2 + $0x394] sm:$0xf]  ;;  %v2002_v21 = vld [vmem:[%s3256_s2 + $0x398] sm:$0xf0] }
  0x5c   :  { %955 = vmatpush.bf16.msra.mxu1 %v1637_v27  ;;  %v1842_v27 = vld [vmem:[%s3256_s2 + $0x258] sm:$0xf0]  ;;  %v1917_v31 = vor.u32 %v2211_v23, %v1914_v24  ;;  %v2201_v23 = vld [vmem:[%s3256_s2 + $0x294] sm:$0xf] }
  0x5d   :  { %943 = vmatpush.bf16.msra.mxu0 %v1565_v30  ;;  %v1970_v30 = vld [vmem:[%s3256_s2 + $0x358] sm:$0xf0]  ;;  %v1845_v34 = vor.u32 %v2193_v26, %v1842_v27  ;;  %v2183_v26 = vld [vmem:[%s3256_s2 + $0x204] sm:$0xf]  ;;  %v1802_v27 = vld [vmem:[%s3256_s2 + $0x208] sm:$0xf0] }
  0x5e   :  { %969 = vmatpush.bf16.msra.mxu2 %v1693_v33  ;;  %v2034_v33 = vld [vmem:[%s3256_s2 + $0x3d8] sm:$0xf0]  ;;  %v1973_v38 = vor.u32 %v2225_v29, %v1970_v30  ;;  %v2005_v29 = vor.u32 %v2233_v20, %v2002_v21  ;;  %v1930_v30 = vld [vmem:[%s3256_s2 + $0x308] sm:$0xf0] }
  0x5f   :  { %982 = vmatpush.bf16.msra.mxu3 %v1757_v37  ;;  %v1906_v37 = vld [vmem:[%s3256_s2 + $0x2d8] sm:$0xf0] }
  0x60   :  { %956 = vmatpush.bf16.msra.mxu1 %v1629_v41  ;;  %v2037_v41 = vor.u32 %v2241_v32, %v2034_v33  ;;  %v1909_v43 = vor.u32 %v2209_v36, %v1906_v37  ;;  %v1874_v24 = vld [vmem:[%s3256_s2 + $0x298] sm:$0xf0]  ;;  %v2262_v32 = vld [vmem:[#allocation2 + $0x74] sm:$0xf0]  ;;  %v1994_v36 = vld [vmem:[%s3256_s2 + $0x388] sm:$0xf0]  ;;  %v1805_v37 = vor.u32 %v2183_v26, %v1802_v27 }
  0x61   :  { %944 = vmatpush.bf16.msra.mxu0 %v1557_v46  ;;  %v1877_v33 = vor.u32 %v2201_v23, %v1874_v24 }
  0x62   :  { %970 = vmatpush.bf16.msra.mxu2 %v1685_v51  ;;  %v1826_v51 = vld [vmem:[%s3256_s2 + $0x238] sm:$0xf0] }
  0x63   :  { %983 = vmatpush.bf16.msra.mxu3 %v1749_v55  ;;  %v1829_v58 = vor.u32 %v2189_v50, %v1826_v51  ;;  %v2256_v50 = vld [vmem:[#allocation2 + $0x44] sm:$0xf0] }
  0x64   :  { %957 = vmatpush.bf16.msra.mxu1 %v1621_v59  ;;  %v2205_v59 = vld [vmem:[%s3256_s2 + $0x2b4] sm:$0xf] }
  0x65   :  { %945 = vmatpush.bf16.msra.mxu0 %v1549_v63  ;;  %v1818_v63 = vld [vmem:[%s3256_s2 + $0x228] sm:$0xf0] }
  0x66   :  { %971 = vmatpush.bf16.msra.mxu2 %v1677_v3  ;;  %v1893_v3 = vor.u32 %v2205_v59, %v1890_v60  ;;  %v1821_v8 = vor.u32 %v2187_v62, %v1818_v63  ;;  %v2248_v59 = vld [vmem:[#allocation2 + $0x4] sm:$0xf0]  ;;  %v3212_v60 = vld [vmem:[%s3255_s1] sm:$0xf] }
  0x67   :  { %984 = vmatpush.bf16.msra.mxu3 %v1741_v12  ;;  %v1882_v12 = vld [vmem:[%s3256_s2 + $0x2a8] sm:$0xf0] }
  0x68   :  { %958 = vmatpush.bf16.msra.mxu1 %v1613_v16  ;;  %946 = vmatmul.bf16.vlgmr.msra.gmra.mxu0 %v2671_v9  ;;  %v2026_v9 = vld [vmem:[%s3256_s2 + $0x3c8] sm:$0xf0] }
  0x69   :  { %990 = vmatpush.bf16.msrb.mxu0 %v1861_v6  ;;  %972 = vmatmul.bf16.vlgmr.msra.gmra.mxu2 %v2661_v4  ;;  %v1834_v4 = vld [vmem:[%s3256_s2 + $0x248] sm:$0xf0]  ;;  %v2029_v52 = vor.u32 %v2239_v45, %v2026_v9  ;;  %v2235_v6 = vld [vmem:[%s3256_s2 + $0x3a4] sm:$0xf] }
  0x6a   :  { %1016 = vmatpush.bf16.msrb.mxu2 %v1989_v11  ;;  %985 = vmatmul.bf16.vlgmr.msra.gmra.mxu3 %v2663_v5  ;;  %v1962_v5 = vld [vmem:[%s3256_s2 + $0x348] sm:$0xf0]  ;;  %v1837_v46 = vor.u32 %v2191_v39, %v1834_v4  ;;  %v2203_v11 = vld [vmem:[%s3256_s2 + $0x2a4] sm:$0xf]  ;;  %v2013_v16 = vor.u32 %v2235_v6, %v2010_v7 }
  0x6b   :  { %1029 = vmatpush.bf16.msrb.mxu3 %v2053_v15  ;;  %959 = vmatmul.bf16.vlgmr.msra.gmra.mxu1 %v2673_v10  ;;  %v1898_v10 = vld [vmem:[%s3256_s2 + $0x2c8] sm:$0xf0]  ;;  %v1965_v49 = vor.u32 %v2223_v42, %v1962_v5  ;;  %v1810_v15 = vld [vmem:[%s3256_s2 + $0x218] sm:$0xf0]  ;;  %v2104_v5 = vld [vmem:[#allocation2 + $0x60] sm:$0xf] }
  0x6c   :  { %1003 = vmatpush.bf16.msrb.mxu1 %v1925_v19  ;;  %v1901_v55 = vor.u32 %v2207_v47, %v1898_v10  ;;  %v1885_v19 = vor.u32 %v2203_v11, %v1882_v12  ;;  %v1866_v39 = vld [vmem:[%s3256_s2 + $0x288] sm:$0xf0]  ;;  %v2258_v47 = vld [vmem:[#allocation2 + $0x54] sm:$0xf0] }
  0x6d   :  { %991 = vmatpush.bf16.msrb.mxu0 %v1853_v22  ;;  %v1813_v22 = vor.u32 %v2185_v14, %v1810_v15 }
  0x6e   :  { %1017 = vmatpush.bf16.msrb.mxu2 %v1981_v25  ;;  %v1941_v25 = vor.u32 %v2217_v17, %v1938_v18 }
  0x6f   :  { %1030 = vmatpush.bf16.msrb.mxu3 %v2045_v28  ;;  %v2215_v28 = vld [vmem:[%s3256_s2 + $0x304] sm:$0xf] }
  0x70   :  { %1004 = vmatpush.bf16.msrb.mxu1 %v1917_v31  ;;  %v2112_v31 = vld [vmem:[#allocation2 + $0x70] sm:$0xf]  ;;  %v1933_v4 = vor.u32 %v2215_v28, %v1930_v30 }
  0x71   :  { %992 = vmatpush.bf16.msrb.mxu0 %v1845_v34  ;;  %v2231_v34 = vld [vmem:[%s3256_s2 + $0x384] sm:$0xf] }
  0x72   :  { %1018 = vmatpush.bf16.msrb.mxu2 %v1973_v38  ;;  %v2199_v38 = vld [vmem:[%s3256_s2 + $0x284] sm:$0xf]  ;;  %v1997_v42 = vor.u32 %v2231_v34, %v1994_v36 }
  0x73   :  { %1031 = vmatpush.bf16.msrb.mxu3 %v2037_v41  ;;  %v2113_v41 = vor.u32 %v2262_v32, %v2112_v31  ;;  %v1869_v45 = vor.u32 %v2199_v38, %v1866_v39 }
  0x74   :  { %1005 = vmatpush.bf16.msrb.mxu1 %v1909_v43  ;;  %v2260_v43 = vld [vmem:[#allocation2 + $0x64] sm:$0xf0] }
  0x75   :  { %993 = vmatpush.bf16.msrb.mxu0 %v1837_v46  ;;  %v2105_v9 = vor.u32 %v2260_v43, %v2104_v5  ;;  %v2096_v46 = vld [vmem:[#allocation2 + $0x50] sm:$0xf]  ;;  %v2261_v43 = vld [vmem:[#allocation2 + $0x74] sm:$0xf] }
  0x76   :  { %1019 = vmatpush.bf16.msrb.mxu2 %v1965_v49  ;;  %v2097_v10 = vor.u32 %v2258_v47, %v2096_v46  ;;  %v2088_v49 = vld [vmem:[#allocation2 + $0x40] sm:$0xf]  ;;  %v2106_v47 = vld [vmem:[#allocation2 + $0x68] sm:$0xf0] }
  0x77   :  { %1032 = vmatpush.bf16.msrb.mxu3 %v2029_v52  ;;  %v2089_v51 = vor.u32 %v2256_v50, %v2088_v49  ;;  %v2080_v52 = vld [vmem:[#allocation2 + $0x30] sm:$0xf] }
  0x78   :  { %1006 = vmatpush.bf16.msrb.mxu1 %v1901_v55  ;;  %v2081_v54 = vor.u32 %v2254_v53, %v2080_v52  ;;  %v2072_v55 = vld [vmem:[#allocation2 + $0x20] sm:$0xf]  ;;  %v2098_v52 = vld [vmem:[#allocation2 + $0x58] sm:$0xf0] }
  0x79   :  { %994 = vmatpush.bf16.msrb.mxu0 %v1829_v58 }
  0x7a   :  { %1020 = vmatpush.bf16.msrb.mxu2 %v1957_v61 }
  0x7b   :  { %1033 = vmatpush.bf16.msrb.mxu3 %v2021_v0 }
  0x7c   :  { %1007 = vmatpush.bf16.msrb.mxu1 %v1893_v3 }
  0x7d   :  { %995 = vmatpush.bf16.msrb.mxu0 %v1821_v8 }
  0x7e   :  { %1021 = vmatpush.bf16.msrb.mxu2 %v1949_v13 }
  0x7f   :  { %1034 = vmatpush.bf16.msrb.mxu3 %v2013_v16 }
  0x80   :  { %1008 = vmatpush.bf16.msrb.mxu1 %v1885_v19 }
  0x81   :  { %996 = vmatpush.bf16.msrb.mxu0 %v1813_v22 }
  0x82   :  { %1022 = vmatpush.bf16.msrb.mxu2 %v1941_v25 }
  0x83   :  { %1035 = vmatpush.bf16.msrb.mxu3 %v2005_v29 }
  0x84   :  { %1009 = vmatpush.bf16.msrb.mxu1 %v1877_v33 }
  0x85   :  { %997 = vmatpush.bf16.msrb.mxu0 %v1805_v37 }
  0x86   :  { %1023 = vmatpush.bf16.msrb.mxu2 %v1933_v4 }
  0x87   :  { %1036 = vmatpush.bf16.msrb.mxu3 %v1997_v42 }
  0x88   :  { %1010 = vmatpush.bf16.msrb.mxu1 %v1869_v45  ;;  %998 = vmatmul.bf16.vlgmr.msrb.gmra.mxu0 %v2857_v44  ;;  %v2073_v44 = vor.u32 %v2252_v56, %v2072_v55  ;;  %v2114_v45 = vld [vmem:[#allocation2 + $0x78] sm:$0xf0]  ;;  %v2255_v55 = vld [vmem:[#allocation2 + $0x44] sm:$0xf]  ;;  %v2090_v56 = vld [vmem:[#allocation2 + $0x48] sm:$0xf0] }
  0x89   :  { %1139 = vmatpush.bf16.msra.mxu0 %v2113_v41  ;;  %1024 = vmatmul.bf16.vlgmr.msrb.gmra.mxu2 %v2841_v35  ;;  %v2250_v35 = vld [vmem:[#allocation2 + $0x14] sm:$0xf0]  ;;  %v2117_v46 = vor.u32 %v2261_v43, %v2114_v45 }
  0x8a   :  { %1037 = vmatmul.bf16.vlgmr.msrb.gmra.mxu3 %v2849_v40  ;;  %v2065_v58 = vor.u32 %v2250_v35, %v2064_v57  ;;  %v2056_v40 = vld [vmem:[#allocation2] sm:$0xf]  ;;  %v2093_v57 = vor.u32 %v2255_v55, %v2090_v56  ;;  %v2253_v35 = vld [vmem:[#allocation2 + $0x34] sm:$0xf] }
  0x8b   :  { %1011 = vmatmul.bf16.vlgmr.msrb.gmra.mxu1 %v2865_v48  ;;  %v2057_v48 = vor.u32 %v2248_v59, %v2056_v40  ;;  %v2251_v59 = vld [vmem:[#allocation2 + $0x24] sm:$0xf] }
  0x8c   :  { %1152 = vmatpush.bf16.msra.mxu1 %v2117_v46  ;;  %v2366_v46 = vmov 0.0  }
  0x8d   :  { %1140 = vmatpush.bf16.msra.mxu0 %v2105_v9  ;;  %v2259_v9 = vld [vmem:[#allocation2 + $0x64] sm:$0xf] }
  0x8e   :  { %v2109_v49 = vor.u32 %v2259_v9, %v2106_v47 }
  0x90   :  { %1153 = vmatpush.bf16.msra.mxu1 %v2109_v49 }
  0x91   :  { %1141 = vmatpush.bf16.msra.mxu0 %v2097_v10 }
  0x95   :  { %1142 = vmatpush.bf16.msra.mxu0 %v2089_v51  ;;  %v2257_v51 = vld [vmem:[#allocation2 + $0x54] sm:$0xf] }
  0x96   :  { %v2101_v53 = vor.u32 %v2257_v51, %v2098_v52 }
  0x98   :  { %1154 = vmatpush.bf16.msra.mxu1 %v2101_v53 }
  0x99   :  { %1143 = vmatpush.bf16.msra.mxu0 %v2081_v54 }
  0x9c   :  { %1155 = vmatpush.bf16.msra.mxu1 %v2093_v57 }
  0x9d   :  { %1144 = vmatpush.bf16.msra.mxu0 %v2073_v44 }
  0xa1   :  { %1145 = vmatpush.bf16.msra.mxu0 %v2065_v58  ;;  %v2082_v58 = vld [vmem:[#allocation2 + $0x38] sm:$0xf0] }
  0xa2   :  { %v2085_v40 = vor.u32 %v2253_v35, %v2082_v58 }
  0xa4   :  { %1156 = vmatpush.bf16.msra.mxu1 %v2085_v40 }
  0xa5   :  { %1146 = vmatpush.bf16.msra.mxu0 %v2057_v48  ;;  %v843_v61 = vpop.f32.mrf.mxu0  ;;  %v2074_v48 = vld [vmem:[#allocation2 + $0x28] sm:$0xf0] }
  0xa8   :  { %1147 = vmatmul.bf16.vlgmr.msra.gmra.mxu0 %v3212_v60  ;;  %v856_v62 = vpop.f32.mrf.mxu1 }
  0xa9   :  { %v857_v63 = vadd.f32 %v856_v62, %v843_v61  ;;  %v2077_v61 = vor.u32 %v2251_v59, %v2074_v48  ;;  %v2249_v62 = vld [vmem:[#allocation2 + $0x14] sm:$0xf] }
  0xab   :  { %1157 = vmatpush.bf16.msra.mxu1 %v2077_v61 }
  0xac   :  { %v869_v1 = vpop.f32.mrf.mxu2 }
  0xad   :  { %v882_v0 = vpop.f32.mrf.mxu3  ;;  %v870_v2 = vadd.f32 %v869_v1, %v857_v63  ;;  %v845_v6 = vpop.f32.mrf.mxu0  ;;  %v2066_v63 = vld [vmem:[#allocation2 + $0x18] sm:$0xf0] }
  0xae   :  { %v2058_v6 = vld [vmem:[#allocation2 + $0x8] sm:$0xf0] }
  0xaf   :  { %v883_v3 = vadd.f32 %v882_v0, %v870_v2  ;;  %v2069_v2 = vor.u32 %v2249_v62, %v2066_v63 }
  0xb0   :  { %v858_v7 = vpop.f32.mrf.mxu1 }
  0xb1   :  { %1158 = vmatpush.bf16.msra.mxu1 %v2069_v2 }
  0xb4   :  { %v871_v11 = vpop.f32.mrf.mxu2 }
  0xb5   :  { %v884_v8 = vpop.f32.mrf.mxu3 }
  0xc5   :  { %v895_v12 = vpop.f32.mrf.mxu0 }
  0xc6   :  { %v896_v13 = vadd.f32 %v895_v12, %v883_v3  ;;  %v2247_v3 = vld [vmem:[#allocation2 + $0x4] sm:$0xf] }
  0xc7   :  { %v2061_v7 = vor.u32 %v2247_v3, %v2058_v6 }
  0xc8   :  { %v908_v14 = vpop.f32.mrf.mxu1 }
  0xc9   :  { %v909_v15 = vadd.f32 %v908_v14, %v896_v13  ;;  %1159 = vmatpush.bf16.msra.mxu1 %v2061_v7 }
  0xcc   :  { %v921_v16 = vpop.f32.mrf.mxu2  ;;  %1160 = vmatmul.bf16.vlgmr.msra.gmra.mxu1 %v3212_v60 }
  0xcd   :  { %v922_v17 = vadd.f32 %v921_v16, %v909_v15  ;;  %v934_v18 = vpop.f32.mrf.mxu3  ;;  %v897_v20 = vpop.f32.mrf.mxu0 }
  0xcf   :  { %v3215_v19 = vadd.f32 %v934_v18, %v922_v17 }
  0xd0   :  { %v910_v21 = vpop.f32.mrf.mxu1 }
  0xd1   :  { %v1165_v11 = vmul.f32 %v3215_v19, %v3215_v19 }
  0xd4   :  { %v923_v22 = vpop.f32.mrf.mxu2 }
  0xd5   :  { %v936_v23 = vpop.f32.mrf.mxu3 }
  0xe5   :  { %v947_v24 = vpop.f32.mrf.mxu0 }
  0xe8   :  { %v960_v25 = vpop.f32.mrf.mxu1 }
  0xe9   :  { %v961_v26 = vadd.f32 %v960_v25, %v947_v24 }
  0xec   :  { %v973_v27 = vpop.f32.mrf.mxu2 }
  0xed   :  { %v974_v28 = vadd.f32 %v973_v27, %v961_v26  ;;  %v986_v29 = vpop.f32.mrf.mxu3  ;;  %v949_v31 = vpop.f32.mrf.mxu0 }
  0xef   :  { %v987_v30 = vadd.f32 %v986_v29, %v974_v28 }
  0xf0   :  { %v962_v32 = vpop.f32.mrf.mxu1 }
  0xf4   :  { %v975_v33 = vpop.f32.mrf.mxu2 }
  0xf5   :  { %v988_v34 = vpop.f32.mrf.mxu3 }
 0x105   :  { %v999_v36 = vpop.f32.mrf.mxu0 }
 0x106   :  { %v1000_v37 = vadd.f32 %v999_v36, %v987_v30 }
 0x108   :  { %v1012_v38 = vpop.f32.mrf.mxu1 }
 0x109   :  { %v1013_v39 = vadd.f32 %v1012_v38, %v1000_v37  ;;  %v1305_v38 = vlaneseq }
 0x10c   :  { %v1025_v4 = vpop.f32.mrf.mxu2 }
 0x10d   :  { %v1026_v41 = vadd.f32 %v1025_v4, %v1013_v39  ;;  %v1038_v42 = vpop.f32.mrf.mxu3  ;;  %v1001_v5 = vpop.f32.mrf.mxu0 }
 0x10f   :  { %v3217_v10 = vadd.f32 %v1038_v42, %v1026_v41  ;;  %v1306_v41 = vshrl.u32 %v1305_v38, 7  ;;  %v1308_v42 = vand.u32 127, %v1305_v38 }
 0x110   :  { %v1014_v50 = vpop.f32.mrf.mxu1 }
 0x111   :  { %vm1309_vm8 = vcmp.eq.s32.totalorder %v1306_v41, %v1308_v42  ;;  %v1167_v56 = vmul.f32 %v3217_v10, %v3217_v10 }
 0x114   :  { %v1027_v54 = vpop.f32.mrf.mxu2 }
 0x115   :  { %v1040_v44 = vpop.f32.mrf.mxu3 }
 0x125   :  { %v1148_v0 = vpop.f32.mrf.mxu0 }
 0x126   :  { %v1166_v1 = vmul.f32 %v1148_v0, %v1148_v0 }
 0x128   :  { %1171 = vadd.xlane.f32.xlu0 %v1166_v1 }
 0x12d   :  { %v1150_v8 = vpop.f32.mrf.mxu0 }
 0x130   :  { %1169 = vadd.xlane.f32.xlu0 %v1165_v11 }
 0x149   :  { %v1161_v60 = vpop.f32.mrf.mxu1 }
 0x14a   :  { %v1168_v28 = vmul.f32 %v1161_v60, %v1161_v60 }
 0x14c   :  { %1175 = vadd.xlane.f32.xlu2 %v1168_v28 }
 0x151   :  { %v1163_v33 = vpop.f32.mrf.mxu1 }
 0x19b   :  { %v1172_v12 = vpop.xlane.xlu0 %1171 }
 0x19c   :  { %v1178_v13 = vadd.f32 1e-12, %v1172_v12 }
 0x19e   :  { %2289 = vrsqrt.f32 %v1178_v13  ;;  %vm1197_vm1 = vweird.f32 %v1178_v13 }
 0x1a3   :  { %v1170_v14 = vpop.xlane.xlu0 %1169 }
 0x1a4   :  { %v2290_v15 = vpop.eup %2289  ;;  %v1177_v16 = vadd.f32 1e-12, %v1170_v14 }
 0x1a5   :  { %v1192_v17 = vmul.f32 %v2290_v15, %v1178_v13  ;;  %vm1198_vm0 = vweird.f32 %v2290_v15 }
 0x1a6   :  { %2291 = vrsqrt.f32 %v1177_v16  ;;  %vm1199_vm2 = vmor %vm1197_vm1, %vm1198_vm0  ;;  %vm1187_vm4 = vweird.f32 %v1177_v16 }
 0x1a7   :  { %v1193_v18 = vmul.f32 %v2290_v15, %v1192_v17 }
 0x1a9   :  { %v1194_v20 = vmul.f32 0.5, %v1193_v18 }
 0x1ab   :  { %v1195_v21 = vsub.f32 1.5, %v1194_v20 }
 0x1ac   :  { %v2292_v22 = vpop.eup %2291 }
 0x1ad   :  { %v1196_v23 = vmul.f32 %v2290_v15, %v1195_v21  ;;  %v1182_v24 = vmul.f32 %v2292_v22, %v1177_v16  ;;  %vm1188_vm3 = vweird.f32 %v2292_v22 }
 0x1ae   :  { %vm1189_vm5 = vmor %vm1187_vm4, %vm1188_vm3 }
 0x1af   :  { %v1200_v25 = vsel %vm1199_vm2, %v2290_v15, %v1196_v23  ;;  %v1183_v26 = vmul.f32 %v2292_v22, %v1182_v24 }
 0x1b0   :  { %v1222_v27 = vmul.f32 %v1200_v25, %v1148_v0 }
 0x1b1   :  { %v1184_v29 = vmul.f32 0.5, %v1183_v26 }
 0x1b2   :  { %1240 = vmatpush.xpose.msra.mxu2 %v1222_v27 }
 0x1b3   :  { %v1185_v30 = vsub.f32 1.5, %v1184_v29 }
 0x1b5   :  { %v1186_v31 = vmul.f32 %v2292_v22, %v1185_v30 }
 0x1b7   :  { %v1190_v32 = vsel %vm1189_vm5, %v2292_v22, %v1186_v31 }
 0x1b8   :  { %v1221_v34 = vmul.f32 %v1190_v32, %v3215_v19  ;;  %v2118_v19 = vsel %vm1309_vm8, 1.0, %v2366_v46 }
 0x1ba   :  { %1241 = vmatmul.f32.vlgmr.msra.gmra.mxu2 %v1221_v34 }
 0x1bf   :  { %v1176_v36 = vpop.xlane.xlu2 %1175 }
 0x1c0   :  { %v1180_v37 = vadd.f32 1e-12, %v1176_v36 }
 0x1c2   :  { %2293 = vrsqrt.f32 %v1180_v37  ;;  %vm1217_vm6 = vweird.f32 %v1180_v37 }
 0x1c8   :  { %v2294_v39 = vpop.eup %2293 }
 0x1c9   :  { %v1212_v4 = vmul.f32 %v2294_v39, %v1180_v37  ;;  %vm1218_vm7 = vweird.f32 %v2294_v39 }
 0x1ca   :  { %vm1219_vm9 = vmor %vm1217_vm6, %vm1218_vm7 }
 0x1cb   :  { %v1213_v5 = vmul.f32 %v2294_v39, %v1212_v4 }
 0x1cd   :  { %v1214_v43 = vmul.f32 0.5, %v1213_v5 }
 0x1cf   :  { %v1215_v45 = vsub.f32 1.5, %v1214_v43 }
 0x1d1   :  { %v1216_v47 = vmul.f32 %v2294_v39, %v1215_v45 }
 0x1d3   :  { %v1220_v50 = vsel %vm1219_vm9, %v2294_v39, %v1216_v47 }
 0x1d4   :  { %v1224_v53 = vmul.f32 %v1220_v50, %v1161_v60 }
 0x1d6   :  { %1280 = vmatpush.xpose.msrb.mxu2 %v1224_v53 }
 0x1d9   :  { %1281 = vmatmul.f32.vlgmr.msrb.gmra.mxu2 %v1224_v53 }
 0x23d   :  { %v1242_v9 = vpop.f32.mrf.mxu2 }
 0x23e   :  { %v1313_v49 = vmul.f32 14.285714, %v1242_v9  ;;  %v3225_v55 = vmul.f32 10.0, %v1242_v9 }
 0x240   :  { %v1315_v51 = vsel %vm1314_vm10, %v1313_v49, -inf  ;;  %v1344_v52 = vmul.f32 %v2118_v19, %v1313_v49  ;;  %v1420_v44 = vsel %vm1314_vm10, %v3225_v55, -inf  ;;  %v2367_v19 = vmov 8.0  }
 0x241   :  { %1316 = vmax.xlane.f32.xlu1 %v1315_v51 }
 0x242   :  { %v1345_v54 = vsel %vm1314_vm10, %v1344_v52, 0.0 }
 0x243   :  { %1346 = vadd.xlane.f32.xlu0 %v1345_v54 }
 0x249   :  { %1173 = vadd.xlane.f32.xlu1 %v1167_v56 }
 0x24b   :  { %1421 = vmax.xlane.f32.xlu0 %v1420_v44 }
 0x25c   :  { %v1282_v38 = vpop.f32.mrf.mxu2 }
 0x2b4   :  { %v1317_v57 = vpop.xlane.xlu1 %1316 }
 0x2b5   :  { %v1318_v35 = vrot.slane %v1317_v57, 4 }
 0x2b6   :  { %v1347_v58 = vpop.xlane.xlu0 %1346 }
 0x2b7   :  { %v1319_v40 = vmax.f32 %v1317_v57, %v1318_v35  ;;  %v1348_v59 = vrot.slane %v1347_v58, 4 }
 0x2b9   :  { %v1320_v48 = vrot.slane %v1319_v40, 2  ;;  %v1349_v61 = vadd.f32 %v1348_v59, %v1347_v58 }
 0x2bb   :  { %v1350_v62 = vrot.slane %v1349_v61, 2  ;;  %v1321_v63 = vmax.f32 %v1319_v40, %v1320_v48 }
 0x2bc   :  { %v1174_v0 = vpop.xlane.xlu1 %1173 }
 0x2bd   :  { %v1179_v1 = vadd.f32 1e-12, %v1174_v0  ;;  %v1322_v2 = vrot.slane %v1321_v63, 1  ;;  %v1351_v3 = vadd.f32 %v1350_v62, %v1349_v61 }
 0x2be   :  { %v1422_v50 = vpop.xlane.xlu0 %1421 }
 0x2bf   :  { %2295 = vrsqrt.f32 %v1179_v1  ;;  %v1323_v6 = vmax.f32 %v1321_v63, %v1322_v2  ;;  %v1352_v7 = vrot.slane %v1351_v3, 1  ;;  %vm1207_vm12 = vweird.f32 %v1179_v1 }
 0x2c0   :  { %v1423_v54 = vrot.slane %v1422_v50, 4 }
 0x2c1   :  { %2263 = vpush %v1323_v6  ;;  %v1353_v8 = vadd.f32 %v1352_v7, %v1351_v3 }
 0x2c2   :  { %v1424_v35 = vmax.f32 %v1422_v50, %v1423_v54 }
 0x2c3   :  { %2265 = vpush %v1353_v8 }
 0x2c4   :  { %v1425_v62 = vrot.slane %v1424_v35, 2 }
 0x2c5   :  { %v2296_v11 = vpop.eup %2295 }
 0x2c6   :  { %v1202_v12 = vmul.f32 %v2296_v11, %v1179_v1  ;;  %vm1208_vm11 = vweird.f32 %v2296_v11  ;;  %v1426_v6 = vmax.f32 %v1424_v35, %v1425_v62 }
 0x2c7   :  { %vm1209_vm13 = vmor %vm1207_vm12, %vm1208_vm11 }
 0x2c8   :  { %v1203_v13 = vmul.f32 %v2296_v11, %v1202_v12 }
 0x2ca   :  { %v1204_v14 = vmul.f32 0.5, %v1203_v13 }
 0x2cc   :  { %v1205_v15 = vsub.f32 1.5, %v1204_v14 }
 0x2ce   :  { %v1206_v16 = vmul.f32 %v2296_v11, %v1205_v15 }
 0x2d0   :  { %v1210_v17 = vsel %vm1209_vm13, %v2296_v11, %v1206_v16  ;;  %v1427_v16 = vrot.slane %v1426_v6, 1 }
 0x2d1   :  { %v1223_v18 = vmul.f32 %v1210_v17, %v3217_v10 }
 0x2d3   :  { %1260 = vmatpush.xpose.msra.mxu3 %v1223_v18 }
 0x2d6   :  { %1261 = vmatmul.f32.vlgmr.msra.gmra.mxu3 %v1223_v18 }
 0x2d7   :  { %1300 = vmatpush.xpose.msrb.mxu3 %v1224_v53 }
 0x2de   :  { %1301 = vmatmul.f32.vlgmr.msrb.gmra.mxu3 %v1223_v18 }
 0x2f2   :  { %s2264_s1 = spop %2263 }
 0x2f3   :  { %v1325_v20 = vstv %s2264_s1 }
 0x2f4   :  { %v1326_v21 = vsub.f32 %v1313_v49, %v1325_v20  ;;  %s2266_s21 = spop %2265 }
 0x2f6   :  { %v1327_v22 = vmul.f32 1.442695, %v1326_v21 }
 0x2f8   :  { %2297 = vpow2.f32 %v1327_v22  ;;  %v1428_v22 = vmax.f32 %v1426_v6, %v1427_v16 }
 0x2fe   :  { %v2298_v23 = vpop.eup %2297 }
 0x2ff   :  { %v1329_v24 = vsel %vm1314_vm10, %v2298_v23, 0.0 }
 0x300   :  { %1330 = vadd.xlane.f32.xlu2 %v1329_v24  ;;  %v1335_v25 = vrot.slane %v1329_v24, 4 }
 0x302   :  { %v1336_v26 = vadd.f32 %v1335_v25, %v1329_v24 }
 0x304   :  { %v1337_v60 = vrot.slane %v1336_v26, 2 }
 0x306   :  { %v1338_v27 = vadd.f32 %v1337_v60, %v1336_v26 }
 0x308   :  { %v1339_v28 = vrot.slane %v1338_v27, 1 }
 0x30a   :  { %v1340_v29 = vadd.f32 %v1339_v28, %v1338_v27 }
 0x30c   :  { %2299 = vlog2.f32 %v1340_v29 }
 0x312   :  { %v2300_v10 = vpop.eup %2299 }
 0x313   :  { %v1342_v30 = vmul.f32 0.6931472, %v2300_v10 }
 0x315   :  { %v1343_v31 = vadd.f32 %v1342_v30, %v1325_v20 }
 0x317   :  { %v1368_v32 = vsel %vm1367_vm14, %v1343_v31, 0.0 }
 0x318   :  { %1369 = vadd.xlane.f32.xlu2 %v1368_v32 }
 0x359   :  { %v1262_v33 = vpop.f32.mrf.mxu3 }
 0x35a   :  { %v1283_v4 = vadd.f32 %v1282_v38, %v1262_v33 }
 0x361   :  { %v1302_v39 = vpop.f32.mrf.mxu3 }
 0x362   :  { %v1303_v42 = vadd.f32 %v1302_v39, %v1283_v4 }
 0x364   :  { %v1312_v43 = vmul.f32 100.0, %v1303_v42 }
 0x366   :  { %v1390_v45 = vsel %vm1314_vm10, %v1312_v43, -inf }
 0x367   :  { %v1401_v9 = vrot.slane %v1390_v45, 4 }
 0x369   :  { %v1402_v46 = vmax.f32 %v1390_v45, %v1401_v9 }
 0x36b   :  { %v1403_v47 = vrot.slane %v1402_v46, 2 }
 0x36d   :  { %v1404_v51 = vmax.f32 %v1402_v46, %v1403_v47 }
 0x36f   :  { %v1405_v56 = vrot.slane %v1404_v51, 1 }
 0x371   :  { %v1406_v58 = vmax.f32 %v1404_v51, %v1405_v56 }
 0x373   :  { %v1331_v34 = vpop.xlane.xlu2 %1330  ;;  %v1407_v0 = vsub.f32 %v1312_v43, %v1406_v58 }
 0x374   :  { %2301 = vlog2.f32 %v1331_v34 }
 0x375   :  { %2303 = vrcp.f32 %v2367_v19  ;;  %v1408_v8 = vmul.f32 1.442695, %v1407_v0 }
 0x377   :  { %2305 = vpow2.f32 %v1408_v8 }
 0x37a   :  { %v2302_v36 = vpop.eup %2301 }
 0x37b   :  { %v1333_v37 = vmul.f32 0.6931472, %v2302_v36  ;;  %v2304_v53 = vpop.eup %2303 }
 0x37c   :  { %v1382_v57 = vmul.f32 8.0, %v2304_v53  ;;  %vm1386_vm0 = vweird.f32 %v2304_v53 }
 0x37d   :  { %v1334_v41 = vadd.f32 %v1333_v37, %v1325_v20  ;;  %v2306_v23 = vpop.eup %2305 }
 0x37e   :  { %v1383_v48 = vsub.f32 1.0, %v1382_v57  ;;  %v1410_v26 = vsel %vm1314_vm10, %v2306_v23, 0.0 }
 0x37f   :  { %v1356_v5 = vsel %vm1355_vm15, %v1334_v41, 0.0  ;;  %v1411_v60 = vrot.slane %v1410_v26, 4 }
 0x380   :  { %1357 = vadd.xlane.f32.xlu1 %v1356_v5  ;;  %v1384_v2 = vmul.f32 %v2304_v53, %v1383_v48 }
 0x381   :  { %v1412_v27 = vadd.f32 %v1411_v60, %v1410_v26 }
 0x382   :  { %v1385_v13 = vadd.f32 %v2304_v53, %v1384_v2 }
 0x383   :  { %v1413_v28 = vrot.slane %v1412_v27, 2 }
 0x384   :  { %v1387_v21 = vsel %vm1386_vm0, %v2304_v53, %v1385_v13 }
 0x385   :  { %v1414_v29 = vadd.f32 %v1413_v28, %v1412_v27 }
 0x387   :  { %v1415_v10 = vrot.slane %v1414_v29, 1 }
 0x388   :  { %1391 = vmax.xlane.f32.xlu1 %v1390_v45 }
 0x389   :  { %v1416_v30 = vadd.f32 %v1415_v10, %v1414_v29 }
 0x38b   :  { %v1370_v49 = vpop.xlane.xlu2 %1369 }
 0x38c   :  { %v1371_v52 = vrot.slane %v1370_v49, 4 }
 0x38e   :  { %v1372_v44 = vadd.f32 %v1371_v52, %v1370_v49 }
 0x390   :  { %v1373_v40 = vrot.slane %v1372_v44, 2 }
 0x392   :  { %v1374_v1 = vadd.f32 %v1373_v40, %v1372_v44 }
 0x394   :  { %v1375_v12 = vrot.slane %v1374_v1, 1 }
 0x396   :  { %v1376_v20 = vadd.f32 %v1375_v12, %v1374_v1 }
 0x3f3   :  { %v1358_v59 = vpop.xlane.xlu1 %1357 }
 0x3f4   :  { %v1359_v61 = vrot.slane %v1358_v59, 4 }
 0x3f6   :  { %v1360_v63 = vadd.f32 %v1359_v61, %v1358_v59 }
 0x3f8   :  { %v1361_v3 = vrot.slane %v1360_v63, 2 }
 0x3fa   :  { %v1362_v7 = vadd.f32 %v1361_v3, %v1360_v63 }
 0x3fb   :  { %v1392_v11 = vpop.xlane.xlu1 %1391 }
 0x3fc   :  { %v1393_v14 = vsub.f32 %v1312_v43, %v1392_v11  ;;  %v1363_v15 = vrot.slane %v1362_v7, 1 }
 0x3fe   :  { %v1394_v17 = vmul.f32 1.442695, %v1393_v14  ;;  %v1364_v18 = vadd.f32 %v1363_v15, %v1362_v7 }
 0x400   :  { %2307 = vpow2.f32 %v1394_v17  ;;  %2267 = vpush %v1364_v18 }
 0x401   :  { %2269 = vpush %v1376_v20  ;;  %2309 = vrcp.f32 %v1416_v30 }
 0x402   :  { %2271 = vpush %v1387_v21 }
 0x403   :  { %2273 = vpush %v1428_v22 }
 0x406   :  { %v2308_v24 = vpop.eup %2307 }
 0x407   :  { %v1396_v25 = vsel %vm1314_vm10, %v2308_v24, 0.0  ;;  %v2310_v31 = vpop.eup %2309 }
 0x408   :  { %1397 = vadd.xlane.f32.xlu2 %v1396_v25  ;;  %v1418_v32 = vmul.f32 %v2310_v31, %v2306_v23 }
 0x40a   :  { %v1484_v33 = vadd.f32 1e-12, %v1418_v32 }
 0x40c   :  { %2311 = vlog2.f32 %v1484_v33 }
 0x412   :  { %v2312_v38 = vpop.eup %2311 }
 0x413   :  { %v1486_v39 = vmul.f32 0.6931472, %v2312_v38 }
 0x415   :  { %v1487_v42 = vsub.f32 %v1486_v39, %v3225_v55 }
 0x417   :  { %v1488_v5 = vmul.f32 %v1487_v42, %v1418_v32 }
 0x419   :  { %v1489_v43 = vsel %vm1314_vm10, %v1488_v5, 0.0 }
 0x431   :  { %s2268_s22 = spop %2267 }
 0x432   :  { %s1366_s23 = ssub.f32 %s2268_s22, %s2266_s21  ;;  %s2270_s24 = spop %2269 }
 0x433   :  { %s1378_s25 = ssub.f32 %s2270_s24, %s2266_s21  ;;  %s3238_s26 = spop %2271 }
 0x434   :  { %s2274_s27 = spop %2273 }
 0x435   :  { %s1379_s3 = sadd.f32 %s1378_s25, %s1366_s23  ;;  %v1430_v34 = vstv %s2274_s27 }
 0x436   :  { %v1431_v36 = vsub.f32 %v3225_v55, %v1430_v34 }
 0x437   :  { %s1380_s0 = smul.f32 0.5, %s1379_s3 }
 0x438   :  { %v1432_v37 = vmul.f32 1.442695, %v1431_v36 }
 0x439   :  { %s1389_s28 = smul.f32 %s3238_s26, %s1380_s0 }
 0x43a   :  { %2313 = vpow2.f32 %v1432_v37 }
 0x43b   :  { %s1520_s29 = smul.f32 0.5, %s1389_s28 }
 0x43d   :  { %1522 = sst [smem:[#allocation5]] %s1520_s29 }
 0x440   :  { %v2314_v4 = vpop.eup %2313 }
 0x441   :  { %v1434_v41 = vsel %vm1314_vm10, %v2314_v4, 0.0 }
 0x442   :  { %1435 = vadd.xlane.f32.xlu0 %v1434_v41  ;;  %v1440_v45 = vrot.slane %v1434_v41, 4 }
 0x444   :  { %v1441_v9 = vadd.f32 %v1440_v45, %v1434_v41 }
 0x446   :  { %v1442_v46 = vrot.slane %v1441_v9, 2 }
 0x448   :  { %v1443_v47 = vadd.f32 %v1442_v46, %v1441_v9 }
 0x44a   :  { %1490 = vadd.xlane.f32.xlu0 %v1489_v43  ;;  %v1444_v50 = vrot.slane %v1443_v47, 1 }
 0x44c   :  { %v1445_v53 = vadd.f32 %v1444_v50, %v1443_v47 }
 0x47b   :  { %v1398_v19 = vpop.xlane.xlu2 %1397 }
 0x47c   :  { %2315 = vrcp.f32 %v1398_v19 }
 0x482   :  { %v2316_v49 = vpop.eup %2315 }
 0x483   :  { %v1400_v51 = vmul.f32 %v2316_v49, %v2308_v24 }
 0x485   :  { %v1449_v52 = vadd.f32 1e-12, %v1400_v51 }
 0x487   :  { %2317 = vlog2.f32 %v1449_v52 }
 0x488   :  { %2319 = vlog2.f32 %v1445_v53 }
 0x48d   :  { %v2318_v54 = vpop.eup %2317 }
 0x48e   :  { %v1451_v56 = vmul.f32 0.6931472, %v2318_v54  ;;  %v2320_v57 = vpop.eup %2319 }
 0x48f   :  { %v1447_v40 = vmul.f32 0.6931472, %v2320_v57 }
 0x490   :  { %v1452_v44 = vsub.f32 %v1451_v56, %v3225_v55 }
 0x491   :  { %v1448_v59 = vadd.f32 %v1447_v40, %v1430_v34 }
 0x492   :  { %v1453_v35 = vmul.f32 %v1452_v44, %v1400_v51 }
 0x493   :  { %v1499_v48 = vsel %vm1367_vm14, %v1448_v59, 0.0 }
 0x494   :  { %v1454_v58 = vsel %vm1314_vm10, %v1453_v35, 0.0 }
 0x495   :  { %1455 = vadd.xlane.f32.xlu1 %v1454_v58 }
 0x49d   :  { %1500 = vadd.xlane.f32.xlu1 %v1499_v48 }
 0x4b5   :  { %v1436_v61 = vpop.xlane.xlu0 %1435 }
 0x4b6   :  { %2321 = vlog2.f32 %v1436_v61 }
 0x4bc   :  { %v2322_v62 = vpop.eup %2321 }
 0x4bd   :  { %v1438_v63 = vmul.f32 0.6931472, %v2322_v62  ;;  %v1491_v12 = vpop.xlane.xlu0 %1490 }
 0x4be   :  { %v1492_v14 = vrot.slane %v1491_v12, 4 }
 0x4bf   :  { %v1439_v0 = vadd.f32 %v1438_v63, %v1430_v34 }
 0x4c0   :  { %v1493_v16 = vadd.f32 %v1492_v14, %v1491_v12 }
 0x4c1   :  { %v1464_v1 = vsel %vm1355_vm15, %v1439_v0, 0.0 }
 0x4c2   :  { %1465 = vadd.xlane.f32.xlu2 %v1464_v1  ;;  %v1494_v18 = vrot.slane %v1493_v16, 2 }
 0x4c4   :  { %v1495_v24 = vadd.f32 %v1494_v18, %v1493_v16 }
 0x4c6   :  { %v1496_v27 = vrot.slane %v1495_v24, 1 }
 0x4c8   :  { %v1497_v30 = vadd.f32 %v1496_v27, %v1495_v24 }
 0x508   :  { %v1456_v2 = vpop.xlane.xlu1 %1455 }
 0x509   :  { %v1457_v55 = vrot.slane %v1456_v2, 4 }
 0x50b   :  { %v1458_v3 = vadd.f32 %v1457_v55, %v1456_v2 }
 0x50d   :  { %v1459_v6 = vrot.slane %v1458_v3, 2 }
 0x50f   :  { %v1460_v7 = vadd.f32 %v1459_v6, %v1458_v3 }
 0x510   :  { %v1501_v13 = vpop.xlane.xlu1 %1500 }
 0x511   :  { %v1461_v8 = vrot.slane %v1460_v7, 1  ;;  %v1502_v15 = vrot.slane %v1501_v13, 4 }
 0x513   :  { %v1462_v11 = vadd.f32 %v1461_v8, %v1460_v7  ;;  %v1503_v17 = vadd.f32 %v1502_v15, %v1501_v13 }
 0x515   :  { %2275 = vpush %v1462_v11  ;;  %v1504_v21 = vrot.slane %v1503_v17, 2 }
 0x517   :  { %v1505_v25 = vadd.f32 %v1504_v21, %v1503_v17 }
 0x519   :  { %v1506_v29 = vrot.slane %v1505_v25, 1 }
 0x51b   :  { %v1507_v31 = vadd.f32 %v1506_v29, %v1505_v25 }
 0x535   :  { %v1466_v20 = vpop.xlane.xlu2 %1465 }
 0x536   :  { %v1467_v22 = vrot.slane %v1466_v20, 4 }
 0x538   :  { %v1468_v23 = vadd.f32 %v1467_v22, %v1466_v20 }
 0x53a   :  { %v1469_v26 = vrot.slane %v1468_v23, 2 }
 0x53c   :  { %v1470_v60 = vadd.f32 %v1469_v26, %v1468_v23 }
 0x53e   :  { %v1471_v28 = vrot.slane %v1470_v60, 1 }
 0x540   :  { %v1472_v10 = vadd.f32 %v1471_v28, %v1470_v60 }
 0x542   :  { %2277 = vpush %v1472_v10 }
 0x543   :  { %2279 = vpush %v1497_v30 }
 0x544   :  { %2281 = vpush %v1507_v31 }
 0x546   :  { %s2276_s30 = spop %2275 }
 0x573   :  { %s2278_s5 = spop %2277 }
 0x574   :  { %s1474_s6 = sadd.f32 %s2278_s5, %s2276_s30  ;;  %s2280_s7 = spop %2279 }
 0x575   :  { %s2282_s8 = spop %2281 }
 0x576   :  { %s1483_s9 = smul.f32 %s3238_s26, %s1474_s6  ;;  %s1509_s10 = sadd.f32 %s2282_s8, %s2280_s7 }
 0x578   :  { %s1518_s11 = smul.f32 %s3238_s26, %s1509_s10 }
 0x57a   :  { %s1519_s15 = sadd.f32 %s1518_s11, %s1483_s9 }
 0x57c   :  { %s1523_s16 = smul.f32 0.5, %s1519_s15 }
 0x57e   :  { %1525 = sst [smem:[#allocation5 + $0x1]] %s1523_s16 }
 0x57f   :  { %1534 = dma.smem_to_vmem %s2368_s17, 16, %s1532_s14, [#allocation4]  }
 0x580   :  { %2361 = dma.done.wait [#allocation4], 16  }
 0x581   :  { %2362 = vsyncadd [#allocation4], 4294967280 }
 0x582   :  { %1539 = sfence }
 0x583   :  { %1540 = vsyncpa [#allocation3], 1 }
 0x584   :  { %1541 = vsyncpa [#allocation4], 1 }

</bundles_post_ra>
